<compile_context>
chip_gen: v7x
topology: tpu7x:2x2x1
jax: 0.10.0
libtpu: 0.0.40
codegen_flags: <defaults>
</compile_context>

<pallas_src>
import jax
import jax.numpy as jnp
import numpy as np
from jax.experimental import pallas as pl
from jax.experimental.pallas import tpu as pltpu

K = 5          # Conv1d kernel size used by every conv layer
PAD = K // 2   # 'same' padding on each side


# ---------------------------------------------------------------------------
# In-kernel helper: Conv1d('same') + bias + ReLU (+ optional fused MaxPool1d(2))
# expressed as a single im2col matmul with batch folded into M.
# ---------------------------------------------------------------------------
def _conv_relu_pool(a, w_ref, b_ref, pool):
    """a: (B, Lc, Cin) f32 value -> (B, Lc or Lc//2, Cout) f32 value."""
    B, Lc, Cin = a.shape
    zpad = jnp.zeros((B, PAD, Cin), jnp.float32)
    a_pad = jnp.concatenate([zpad, a, zpad], axis=1)                 # (B, Lc+K-1, Cin)
    # im2col: row l = [x_pad[l+0], ..., x_pad[l+K-1]] flattened on the lane axis
    cols = jnp.concatenate([a_pad[:, t:t + Lc, :] for t in range(K)], axis=-1)
    cols = cols.reshape(B * Lc, K * Cin).astype(jnp.bfloat16)        # (B*Lc, K*Cin)
    acc = jnp.dot(cols, w_ref[...], preferred_element_type=jnp.float32)
    y = jnp.maximum(acc + b_ref[...], 0.0)                           # (B*Lc, Cout), f32
    Cout = y.shape[-1]
    Lo = Lc
    if pool:  # fused MaxPool1d(2): pairs never cross batch boundary (Lc even)
        y = jnp.max(y.reshape(B * Lc // 2, 2, Cout), axis=1)
        Lo = Lc // 2
    return y.reshape(B, Lo, Cout)


# ---------------------------------------------------------------------------
# Single fused kernel: whole Classifier.forward.
# ---------------------------------------------------------------------------
def _classifier_kernel(x_ref, w1, b1, w2, b2, w3, b3, w4, b4,
                       lw1, lb1, lw3, lb3, o_ref):
    a = _conv_relu_pool(x_ref[...], w1, b1, pool=False)   # relu(conv1): (B, L,   32)
    a = _conv_relu_pool(a, w2, b2, pool=True)             # relu(conv2)+pool1: (B, L/2, 64)
    a = _conv_relu_pool(a, w3, b3, pool=False)            # relu(conv3): (B, L/2, 128)
    a = _conv_relu_pool(a, w4, b4, pool=True)             # relu(conv4)+pool2: (B, L/4, 256)

    feat = jnp.max(a, axis=1)                             # torch: x.max(dim=-1).values -> (B, 256)
    h = jnp.maximum(
        jnp.dot(feat.astype(jnp.bfloat16), lw1[...],
                preferred_element_type=jnp.float32) + lb1[...],
        0.0,
    )
    # TODO(synk): Dropout(0.3) omitted — it is the identity in eval/inference mode.
    logits = jnp.dot(h.astype(jnp.bfloat16), lw3[...],
                     preferred_element_type=jnp.float32) + lb3[...]

    # Numerically-stable softmax with EXACT normalization (approx reciprocal
    # was only ~8-bit accurate and broke the sum-to-1 invariant).
    m = jnp.max(logits, axis=1, keepdims=True)
    e = jnp.exp(logits - m)
    s = jnp.sum(e, axis=1, keepdims=True)
    o_ref[...] = e / s


def classifier_forward(x_ncw, params):
    """x_ncw: (B, C, L) PyTorch NCW input -> (B, n_out) softmax probabilities."""
    x = jnp.transpose(x_ncw, (0, 2, 1)).astype(jnp.float32)  # NCW -> NLC (glue)
    B = x.shape[0]
    n_out = params["lw3"].shape[-1]
    vmem = pl.BlockSpec(memory_space=pltpu.MemorySpace.VMEM)
    args = (x,
            params["cw1"], params["cb1"], params["cw2"], params["cb2"],
            params["cw3"], params["cb3"], params["cw4"], params["cb4"],
            params["lw1"], params["lb1"], params["lw3"], params["lb3"])
    return pl.pallas_call(
        _classifier_kernel,
        out_shape=jax.ShapeDtypeStruct((B, n_out), jnp.float32),
        in_specs=[vmem] * len(args),
        out_specs=vmem,
    )(*args)


# ---------------------------------------------------------------------------
# Pure-JAX reference (same math / same bf16 casts) for correctness checking.
# ---------------------------------------------------------------------------
def classifier_forward_ref(x_ncw, params):
    x = jnp.transpose(x_ncw, (0, 2, 1)).astype(jnp.float32)

    def conv(a, w, b, pool):
        B, Lc, Cin = a.shape
        a_pad = jnp.pad(a, ((0, 0), (PAD, PAD), (0, 0)))
        cols = jnp.concatenate([a_pad[:, t:t + Lc, :] for t in range(K)], axis=-1)
        cols = cols.reshape(B * Lc, K * Cin).astype(jnp.bfloat16)
        y = jnp.maximum(jnp.dot(cols, w, preferred_element_type=jnp.float32) + b, 0.0)
        Cout = y.shape[-1]
        if pool:
            y = jnp.max(y.reshape(B * Lc // 2, 2, Cout), axis=1)
            Lc = Lc // 2
        return y.reshape(B, Lc, Cout)

    a = conv(x, params["cw1"], params["cb1"], False)
    a = conv(a, params["cw2"], params["cb2"], True)
    a = conv(a, params["cw3"], params["cb3"], False)
    a = conv(a, params["cw4"], params["cb4"], True)
    feat = jnp.max(a, axis=1)
    h = jnp.maximum(jnp.dot(feat.astype(jnp.bfloat16), params["lw1"],
                            preferred_element_type=jnp.float32) + params["lb1"], 0.0)
    logits = jnp.dot(h.astype(jnp.bfloat16), params["lw3"],
                     preferred_element_type=jnp.float32) + params["lb3"]
    return jax.nn.softmax(logits, axis=1)


def init_params(key, channels, n_out):
    ks = jax.random.split(key, 12)

    def w(k, shape, fan_in, dtype=jnp.bfloat16):
        v = jax.random.normal(k, shape, jnp.float32) / np.sqrt(float(fan_in))
        return v.astype(dtype)

    return {
        # conv weights flattened im2col-style: (K*Cin, Cout), bf16 (MXU dtype)
        "cw1": w(ks[0], (K * channels, 32), channels * K),
        "cb1": w(ks[1], (1, 32), channels * K, jnp.float32),
        "cw2": w(ks[2], (K * 32, 64), 32 * K),
        "cb2": w(ks[3], (1, 64), 32 * K, jnp.float32),
        "cw3": w(ks[4], (K * 64, 128), 64 * K),
        "cb3": w(ks[5], (1, 128), 64 * K, jnp.float32),
        "cw4": w(ks[6], (K * 128, 256), 128 * K),
        "cb4": w(ks[7], (1, 256), 128 * K, jnp.float32),
        # linear weights stored (in, out), bf16; biases f32
        "lw1": w(ks[8], (256, 90), 256),
        "lb1": w(ks[9], (1, 90), 256, jnp.float32),
        "lw3": w(ks[10], (90, n_out), 90),
        "lb3": w(ks[11], (1, n_out), 90, jnp.float32),
    }


if __name__ == "__main__":
    B, C, L, n_out = 2, 4, 16, 3   # L must be divisible by 4 (two MaxPool1d(2))
    key = jax.random.PRNGKey(0)
    pkey, xkey = jax.random.split(key)
    params = init_params(pkey, C, n_out)
    x = jax.random.normal(xkey, (B, C, L), jnp.float32)   # PyTorch NCW input

    out = jax.jit(classifier_forward)(x, params)
    out = jax.block_until_ready(out)
    ref = jax.block_until_ready(jax.jit(classifier_forward_ref)(x, params))

    assert out.shape == (B, n_out)
    assert np.all(np.isfinite(np.asarray(out)))
    # exact softmax normalization in the kernel -> rows sum to 1 (f32 rounding only)
    assert np.allclose(np.asarray(jnp.sum(out, axis=1)), 1.0, atol=1e-4)
    # kernel vs pure-JAX reference (identical math / identical bf16 casts)
    assert np.allclose(np.asarray(out), np.asarray(ref), atol=3e-3)
    print("KERNEL_OK")
</pallas_src>

<mosaic_0001>
module attributes {stable_mosaic.version = 11 : i64} {
  func.func @_classifier_kernel(%arg0: memref<2x16x4xf32, #tpu.memory_space<vmem>>, %arg1: memref<20x32xbf16, #tpu.memory_space<vmem>>, %arg2: memref<1x32xf32, #tpu.memory_space<vmem>>, %arg3: memref<160x64xbf16, #tpu.memory_space<vmem>>, %arg4: memref<1x64xf32, #tpu.memory_space<vmem>>, %arg5: memref<320x128xbf16, #tpu.memory_space<vmem>>, %arg6: memref<1x128xf32, #tpu.memory_space<vmem>>, %arg7: memref<640x256xbf16, #tpu.memory_space<vmem>>, %arg8: memref<1x256xf32, #tpu.memory_space<vmem>>, %arg9: memref<256x90xbf16, #tpu.memory_space<vmem>>, %arg10: memref<1x90xf32, #tpu.memory_space<vmem>>, %arg11: memref<90x3xbf16, #tpu.memory_space<vmem>>, %arg12: memref<1x3xf32, #tpu.memory_space<vmem>>, %arg13: memref<2x3xf32, #tpu.memory_space<vmem>>) attributes {dimension_semantics = [], scalar_prefetch = 0 : i64, scratch_operands = 0 : i64, tpu.core_type = #tpu.core_type<tc>} {
    %c0 = arith.constant 0 : index
    %c0_0 = arith.constant 0 : index
    %c0_1 = arith.constant 0 : index
    %0 = vector.load %arg0[%c0, %c0_0, %c0_1] : memref<2x16x4xf32, #tpu.memory_space<vmem>>, vector<2x16x4xf32>
    %cst = arith.constant 0.000000e+00 : f32
    %1 = vector.broadcast %cst : f32 to vector<2x2x4xf32>
    %2 = tpu.concatenate %1, %0, %1 in 1 : vector<2x2x4xf32>, vector<2x16x4xf32>, vector<2x2x4xf32> -> vector<2x20x4xf32>
    %3 = vector.extract_strided_slice %2 {offsets = [0, 0, 0], sizes = [2, 16, 4], strides = [1, 1, 1]} : vector<2x20x4xf32> to vector<2x16x4xf32>
    %4 = vector.extract_strided_slice %2 {offsets = [0, 1, 0], sizes = [2, 16, 4], strides = [1, 1, 1]} : vector<2x20x4xf32> to vector<2x16x4xf32>
    %5 = vector.extract_strided_slice %2 {offsets = [0, 2, 0], sizes = [2, 16, 4], strides = [1, 1, 1]} : vector<2x20x4xf32> to vector<2x16x4xf32>
    %6 = vector.extract_strided_slice %2 {offsets = [0, 3, 0], sizes = [2, 16, 4], strides = [1, 1, 1]} : vector<2x20x4xf32> to vector<2x16x4xf32>
    %7 = vector.extract_strided_slice %2 {offsets = [0, 4, 0], sizes = [2, 16, 4], strides = [1, 1, 1]} : vector<2x20x4xf32> to vector<2x16x4xf32>
    %8 = tpu.concatenate %3, %4, %5, %6, %7 in 2 : vector<2x16x4xf32>, vector<2x16x4xf32>, vector<2x16x4xf32>, vector<2x16x4xf32>, vector<2x16x4xf32> -> vector<2x16x20xf32>
    %9 = vector.shape_cast %8 : vector<2x16x20xf32> to vector<32x20xf32>
    %10 = arith.truncf %9 : vector<32x20xf32> to vector<32x20xbf16>
    %c0_2 = arith.constant 0 : index
    %c0_3 = arith.constant 0 : index
    %11 = vector.load %arg1[%c0_2, %c0_3] : memref<20x32xbf16, #tpu.memory_space<vmem>>, vector<20x32xbf16>
    %cst_4 = arith.constant dense<0.000000e+00> : vector<32x32xf32>
    %12 = tpu.matmul %10, %11, %cst_4 {dimension_numbers = #tpu.dot_dimension_numbers<[1], [0], [0], [1], [0, 0, 1, 1], [], []>} : vector<32x20xbf16>, vector<20x32xbf16>, vector<32x32xf32> -> vector<32x32xf32>
    %c0_5 = arith.constant 0 : index
    %c0_6 = arith.constant 0 : index
    %13 = vector.load %arg2[%c0_5, %c0_6] : memref<1x32xf32, #tpu.memory_space<vmem>>, vector<1x32xf32>
    %14 = vector.broadcast %13 : vector<1x32xf32> to vector<32x32xf32>
    %15 = arith.addf %12, %14 : vector<32x32xf32>
    %cst_7 = arith.constant 0.000000e+00 : f32
    %16 = vector.broadcast %cst_7 : f32 to vector<32x32xf32>
    %17 = arith.maximumf %15, %16 : vector<32x32xf32>
    %18 = vector.shape_cast %17 : vector<32x32xf32> to vector<2x16x32xf32>
    %cst_8 = arith.constant 0.000000e+00 : f32
    %19 = vector.broadcast %cst_8 : f32 to vector<2x2x32xf32>
    %20 = tpu.concatenate %19, %18, %19 in 1 : vector<2x2x32xf32>, vector<2x16x32xf32>, vector<2x2x32xf32> -> vector<2x20x32xf32>
    %21 = vector.extract_strided_slice %20 {offsets = [0, 0, 0], sizes = [2, 16, 32], strides = [1, 1, 1]} : vector<2x20x32xf32> to vector<2x16x32xf32>
    %22 = vector.extract_strided_slice %20 {offsets = [0, 1, 0], sizes = [2, 16, 32], strides = [1, 1, 1]} : vector<2x20x32xf32> to vector<2x16x32xf32>
    %23 = vector.extract_strided_slice %20 {offsets = [0, 2, 0], sizes = [2, 16, 32], strides = [1, 1, 1]} : vector<2x20x32xf32> to vector<2x16x32xf32>
    %24 = vector.extract_strided_slice %20 {offsets = [0, 3, 0], sizes = [2, 16, 32], strides = [1, 1, 1]} : vector<2x20x32xf32> to vector<2x16x32xf32>
    %25 = vector.extract_strided_slice %20 {offsets = [0, 4, 0], sizes = [2, 16, 32], strides = [1, 1, 1]} : vector<2x20x32xf32> to vector<2x16x32xf32>
    %26 = tpu.concatenate %21, %22, %23, %24, %25 in 2 : vector<2x16x32xf32>, vector<2x16x32xf32>, vector<2x16x32xf32>, vector<2x16x32xf32>, vector<2x16x32xf32> -> vector<2x16x160xf32>
    %27 = vector.shape_cast %26 : vector<2x16x160xf32> to vector<32x160xf32>
    %28 = arith.truncf %27 : vector<32x160xf32> to vector<32x160xbf16>
    %c0_9 = arith.constant 0 : index
    %c0_10 = arith.constant 0 : index
    %29 = vector.load %arg3[%c0_9, %c0_10] : memref<160x64xbf16, #tpu.memory_space<vmem>>, vector<160x64xbf16>
    %cst_11 = arith.constant dense<0.000000e+00> : vector<32x64xf32>
    %30 = tpu.matmul %28, %29, %cst_11 {dimension_numbers = #tpu.dot_dimension_numbers<[1], [0], [0], [1], [0, 0, 1, 1], [], []>} : vector<32x160xbf16>, vector<160x64xbf16>, vector<32x64xf32> -> vector<32x64xf32>
    %c0_12 = arith.constant 0 : index
    %c0_13 = arith.constant 0 : index
    %31 = vector.load %arg4[%c0_12, %c0_13] : memref<1x64xf32, #tpu.memory_space<vmem>>, vector<1x64xf32>
    %32 = vector.broadcast %31 : vector<1x64xf32> to vector<32x64xf32>
    %33 = arith.addf %30, %32 : vector<32x64xf32>
    %cst_14 = arith.constant 0.000000e+00 : f32
    %34 = vector.broadcast %cst_14 : f32 to vector<32x64xf32>
    %35 = arith.maximumf %33, %34 : vector<32x64xf32>
    %36 = vector.shape_cast %35 : vector<32x64xf32> to vector<16x2x64xf32>
    %cst_15 = arith.constant dense<0xFF800000> : vector<16x64xf32>
    %37 = vector.multi_reduction <maximumf>, %36, %cst_15 [1] : vector<16x2x64xf32> to vector<16x64xf32>
    %38 = vector.shape_cast %37 : vector<16x64xf32> to vector<2x8x64xf32>
    %cst_16 = arith.constant 0.000000e+00 : f32
    %39 = vector.broadcast %cst_16 : f32 to vector<2x2x64xf32>
    %40 = tpu.concatenate %39, %38, %39 in 1 : vector<2x2x64xf32>, vector<2x8x64xf32>, vector<2x2x64xf32> -> vector<2x12x64xf32>
    %41 = vector.extract_strided_slice %40 {offsets = [0, 0, 0], sizes = [2, 8, 64], strides = [1, 1, 1]} : vector<2x12x64xf32> to vector<2x8x64xf32>
    %42 = vector.extract_strided_slice %40 {offsets = [0, 1, 0], sizes = [2, 8, 64], strides = [1, 1, 1]} : vector<2x12x64xf32> to vector<2x8x64xf32>
    %43 = vector.extract_strided_slice %40 {offsets = [0, 2, 0], sizes = [2, 8, 64], strides = [1, 1, 1]} : vector<2x12x64xf32> to vector<2x8x64xf32>
    %44 = vector.extract_strided_slice %40 {offsets = [0, 3, 0], sizes = [2, 8, 64], strides = [1, 1, 1]} : vector<2x12x64xf32> to vector<2x8x64xf32>
    %45 = vector.extract_strided_slice %40 {offsets = [0, 4, 0], sizes = [2, 8, 64], strides = [1, 1, 1]} : vector<2x12x64xf32> to vector<2x8x64xf32>
    %46 = tpu.concatenate %41, %42, %43, %44, %45 in 2 : vector<2x8x64xf32>, vector<2x8x64xf32>, vector<2x8x64xf32>, vector<2x8x64xf32>, vector<2x8x64xf32> -> vector<2x8x320xf32>
    %47 = vector.shape_cast %46 : vector<2x8x320xf32> to vector<16x320xf32>
    %48 = arith.truncf %47 : vector<16x320xf32> to vector<16x320xbf16>
    %c0_17 = arith.constant 0 : index
    %c0_18 = arith.constant 0 : index
    %49 = vector.load %arg5[%c0_17, %c0_18] : memref<320x128xbf16, #tpu.memory_space<vmem>>, vector<320x128xbf16>
    %cst_19 = arith.constant dense<0.000000e+00> : vector<16x128xf32>
    %50 = tpu.matmul %48, %49, %cst_19 {dimension_numbers = #tpu.dot_dimension_numbers<[1], [0], [0], [1], [0, 0, 1, 1], [], []>} : vector<16x320xbf16>, vector<320x128xbf16>, vector<16x128xf32> -> vector<16x128xf32>
    %c0_20 = arith.constant 0 : index
    %c0_21 = arith.constant 0 : index
    %51 = vector.load %arg6[%c0_20, %c0_21] : memref<1x128xf32, #tpu.memory_space<vmem>>, vector<1x128xf32>
    %52 = vector.broadcast %51 : vector<1x128xf32> to vector<16x128xf32>
    %53 = arith.addf %50, %52 : vector<16x128xf32>
    %cst_22 = arith.constant 0.000000e+00 : f32
    %54 = vector.broadcast %cst_22 : f32 to vector<16x128xf32>
    %55 = arith.maximumf %53, %54 : vector<16x128xf32>
    %56 = vector.shape_cast %55 : vector<16x128xf32> to vector<2x8x128xf32>
    %cst_23 = arith.constant 0.000000e+00 : f32
    %57 = vector.broadcast %cst_23 : f32 to vector<2x2x128xf32>
    %58 = tpu.concatenate %57, %56, %57 in 1 : vector<2x2x128xf32>, vector<2x8x128xf32>, vector<2x2x128xf32> -> vector<2x12x128xf32>
    %59 = vector.extract_strided_slice %58 {offsets = [0, 0, 0], sizes = [2, 8, 128], strides = [1, 1, 1]} : vector<2x12x128xf32> to vector<2x8x128xf32>
    %60 = vector.extract_strided_slice %58 {offsets = [0, 1, 0], sizes = [2, 8, 128], strides = [1, 1, 1]} : vector<2x12x128xf32> to vector<2x8x128xf32>
    %61 = vector.extract_strided_slice %58 {offsets = [0, 2, 0], sizes = [2, 8, 128], strides = [1, 1, 1]} : vector<2x12x128xf32> to vector<2x8x128xf32>
    %62 = vector.extract_strided_slice %58 {offsets = [0, 3, 0], sizes = [2, 8, 128], strides = [1, 1, 1]} : vector<2x12x128xf32> to vector<2x8x128xf32>
    %63 = vector.extract_strided_slice %58 {offsets = [0, 4, 0], sizes = [2, 8, 128], strides = [1, 1, 1]} : vector<2x12x128xf32> to vector<2x8x128xf32>
    %64 = tpu.concatenate %59, %60, %61, %62, %63 in 2 : vector<2x8x128xf32>, vector<2x8x128xf32>, vector<2x8x128xf32>, vector<2x8x128xf32>, vector<2x8x128xf32> -> vector<2x8x640xf32>
    %65 = vector.shape_cast %64 : vector<2x8x640xf32> to vector<16x640xf32>
    %66 = arith.truncf %65 : vector<16x640xf32> to vector<16x640xbf16>
    %c0_24 = arith.constant 0 : index
    %c0_25 = arith.constant 0 : index
    %67 = vector.load %arg7[%c0_24, %c0_25] : memref<640x256xbf16, #tpu.memory_space<vmem>>, vector<640x256xbf16>
    %cst_26 = arith.constant dense<0.000000e+00> : vector<16x256xf32>
    %68 = tpu.matmul %66, %67, %cst_26 {dimension_numbers = #tpu.dot_dimension_numbers<[1], [0], [0], [1], [0, 0, 1, 1], [], []>} : vector<16x640xbf16>, vector<640x256xbf16>, vector<16x256xf32> -> vector<16x256xf32>
    %c0_27 = arith.constant 0 : index
    %c0_28 = arith.constant 0 : index
    %69 = vector.load %arg8[%c0_27, %c0_28] : memref<1x256xf32, #tpu.memory_space<vmem>>, vector<1x256xf32>
    %70 = vector.broadcast %69 : vector<1x256xf32> to vector<16x256xf32>
    %71 = arith.addf %68, %70 : vector<16x256xf32>
    %cst_29 = arith.constant 0.000000e+00 : f32
    %72 = vector.broadcast %cst_29 : f32 to vector<16x256xf32>
    %73 = arith.maximumf %71, %72 : vector<16x256xf32>
    %74 = vector.shape_cast %73 : vector<16x256xf32> to vector<8x2x256xf32>
    %cst_30 = arith.constant dense<0xFF800000> : vector<8x256xf32>
    %75 = vector.multi_reduction <maximumf>, %74, %cst_30 [1] : vector<8x2x256xf32> to vector<8x256xf32>
    %76 = vector.shape_cast %75 : vector<8x256xf32> to vector<2x4x256xf32>
    %cst_31 = arith.constant dense<0xFF800000> : vector<2x256xf32>
    %77 = vector.multi_reduction <maximumf>, %76, %cst_31 [1] : vector<2x4x256xf32> to vector<2x256xf32>
    %78 = arith.truncf %77 : vector<2x256xf32> to vector<2x256xbf16>
    %c0_32 = arith.constant 0 : index
    %c0_33 = arith.constant 0 : index
    %79 = vector.load %arg9[%c0_32, %c0_33] : memref<256x90xbf16, #tpu.memory_space<vmem>>, vector<256x90xbf16>
    %cst_34 = arith.constant dense<0.000000e+00> : vector<2x90xf32>
    %80 = tpu.matmul %78, %79, %cst_34 {dimension_numbers = #tpu.dot_dimension_numbers<[1], [0], [0], [1], [0, 0, 1, 1], [], []>} : vector<2x256xbf16>, vector<256x90xbf16>, vector<2x90xf32> -> vector<2x90xf32>
    %c0_35 = arith.constant 0 : index
    %c0_36 = arith.constant 0 : index
    %81 = vector.load %arg10[%c0_35, %c0_36] : memref<1x90xf32, #tpu.memory_space<vmem>>, vector<1x90xf32>
    %82 = vector.broadcast %81 : vector<1x90xf32> to vector<2x90xf32>
    %83 = arith.addf %80, %82 : vector<2x90xf32>
    %cst_37 = arith.constant 0.000000e+00 : f32
    %84 = vector.broadcast %cst_37 : f32 to vector<2x90xf32>
    %85 = arith.maximumf %83, %84 : vector<2x90xf32>
    %86 = arith.truncf %85 : vector<2x90xf32> to vector<2x90xbf16>
    %c0_38 = arith.constant 0 : index
    %c0_39 = arith.constant 0 : index
    %87 = vector.load %arg11[%c0_38, %c0_39] : memref<90x3xbf16, #tpu.memory_space<vmem>>, vector<90x3xbf16>
    %cst_40 = arith.constant dense<0.000000e+00> : vector<2x3xf32>
    %88 = tpu.matmul %86, %87, %cst_40 {dimension_numbers = #tpu.dot_dimension_numbers<[1], [0], [0], [1], [0, 0, 1, 1], [], []>} : vector<2x90xbf16>, vector<90x3xbf16>, vector<2x3xf32> -> vector<2x3xf32>
    %c0_41 = arith.constant 0 : index
    %c0_42 = arith.constant 0 : index
    %89 = vector.load %arg12[%c0_41, %c0_42] : memref<1x3xf32, #tpu.memory_space<vmem>>, vector<1x3xf32>
    %90 = vector.broadcast %89 : vector<1x3xf32> to vector<2x3xf32>
    %91 = arith.addf %88, %90 : vector<2x3xf32>
    %cst_43 = arith.constant dense<0xFF800000> : vector<2xf32>
    %92 = vector.multi_reduction <maximumf>, %91, %cst_43 [1] : vector<2x3xf32> to vector<2xf32>
    %93 = vector.shape_cast %92 : vector<2xf32> to vector<2x1xf32>
    %94 = vector.broadcast %93 : vector<2x1xf32> to vector<2x3xf32>
    %95 = arith.subf %91, %94 : vector<2x3xf32>
    %96 = math.exp %95 : vector<2x3xf32>
    %cst_44 = arith.constant dense<0.000000e+00> : vector<2xf32>
    %97 = vector.multi_reduction <add>, %96, %cst_44 [1] : vector<2x3xf32> to vector<2xf32>
    %98 = vector.shape_cast %97 : vector<2xf32> to vector<2x1xf32>
    %99 = vector.broadcast %98 : vector<2x1xf32> to vector<2x3xf32>
    %100 = arith.divf %96, %99 : vector<2x3xf32>
    %c0_45 = arith.constant 0 : index
    %c0_46 = arith.constant 0 : index
    %101 = vector.load %arg13[%c0_45, %c0_46] : memref<2x3xf32, #tpu.memory_space<vmem>>, vector<2x3xf32>
    tpu.vector_store %arg13[%c0_45, %c0_46], %100 {strides = array<i32>} : memref<2x3xf32, #tpu.memory_space<vmem>>, vector<2x3xf32>,
    return
  }
}

</mosaic_0001>

<bundles_post_ra>
// kernel: classifier_forward.1
= control target key start
LH: loop header
LB: loop body
LE: loop exit
PB: predicated region body
PF: predicated region fallthrough
CT: control target
= control target key end

     0   :  { %18 = vsyncpa [#allocation3], 0  ;;  %s3604_s0 = inlined_call_operand.vmem [shape: f32[2,16,4], index: 0, kind: input, shape index: {}]   ;;  %s3605_s1 = inlined_call_operand.vmem [shape: bf16[20,32], index: 1, kind: input, shape index: {}]   ;;  %s3606_s2 = inlined_call_operand.vmem [shape: f32[1,32], index: 2, kind: input, shape index: {}]   ;;  %s3607_s3 = inlined_call_operand.vmem [shape: bf16[160,64], index: 3, kind: input, shape index: {}]   ;;  %s3608_s4 = inlined_call_operand.vmem [shape: f32[1,64], index: 4, kind: input, shape index: {}]   ;;  %s3609_s5 = inlined_call_operand.vmem [shape: bf16[320,128], index: 5, kind: input, shape index: {}]   ;;  %s3610_s6 = inlined_call_operand.vmem [shape: f32[1,128], index: 6, kind: input, shape index: {}]   ;;  %s3611_s7 = inlined_call_operand.hbm [shape: bf16[640,256], index: 7, kind: input, shape index: {}]   ;;  %s3612_s8 = inlined_call_operand.vmem [shape: f32[1,256], index: 8, kind: input, shape index: {}]   ;;  %s3613_s9 = inlined_call_operand.vmem [shape: bf16[256,90], index: 9, kind: input, shape index: {}]   ;;  %s3614_s10 = inlined_call_operand.vmem [shape: f32[1,90], index: 10, kind: input, shape index: {}]   ;;  %s3615_s11 = inlined_call_operand.vmem [shape: bf16[90,3], index: 11, kind: input, shape index: {}]   ;;  %s3616_s12 = inlined_call_operand.vmem [shape: f32[1,3], index: 12, kind: input, shape index: {}]   ;;  %s3617_s13 = inlined_call_operand.hbm [shape: f32[2,3], index: 13, kind: output, shape index: {}]  }
   0x1   :  { %19 = vsyncpa [#allocation4], 0  ;;  %s2925_s25 = smov [#allocation2]   ;;  %s2877_s29 = scalar_lea.hbm %s3611_s7, 10240 }
   0x2   :  { %s39_s26 = sshll.u32 %s2925_s25, 4  ;;  %p2878_p0 = scmp.ne.s32.totalorder %s3611_s7, %s2877_s29  ;;  %s40_s26 = int_to_ptr.vmem [resolvable:$true] %s39_s26 }
   0x3   :  { %p2881_p1 = scmp.lt.u32.totalorder %s2877_s29, %s3611_s7 }
   0x5   :  { %p2883_p2 = pnand %p2881_p1, %p2878_p0 }
   0x7   :  { %2886 = shalt.err (!%p2883_p2)
}
   0x8   :  { %s2887_s17 = scalar_lea.vmem %s40_s26, 10240  ;;  %p2892_p4 = scmp.lt.s32.totalorder %s40_s26, %s40_s26 }
   0x9   :  { %p2888_p3 = scmp.ne.s32.totalorder %s40_s26, %s2887_s17  ;;  %p2893_p5 = scmp.lt.s32.totalorder %s2887_s17, %s2887_s17 }
   0xb   :  { %p2894_p6 = por %p2893_p5, %p2892_p4 }
   0xd   :  { %p2895_p7 = pnand %p2894_p6, %p2888_p3 }
   0xf   :  { %2898 = shalt.err (!%p2895_p7)
}
  0x10   :  { %s2926_s18 = smov 128   ;;  %s2927_s19 = smov 8  }
  0x11   :  { %45 = dma.hbm_to_vmem [thread:$0]  %s3611_s7, 10240, %s40_s26, [#allocation3], %s2926_s18, %s2926_s18, %s2927_s19  }
  0x12   :  { %2921 = dma.done.wait [#allocation3], 10240  }
  0x13   :  { %2922 = vsyncadd [#allocation3], 4294957056  ;;  %vm68_vm0 = vcmask 1041408   ;;  %vm112_vm1 = vcmask 1045504   ;;  %vm89_vm2 = vcmask 1046528   ;;  %v60_v0 = vld [vmem:[%s3604_s0] sm:$0xff] }
  0x14   :  { %v61_v1 = vld [vmem:[%s3604_s0 + $0x8] sm:$0xff]  ;;  %v62_v2 = vld [vmem:[%s3604_s0 + $0x10] sm:$0xff]  ;;  %vm135_vm3 = vcmask 1044480   ;;  %v69_v3 = vrot.slane %v60_v0, 6  ;;  %v63_v5 = vld [vmem:[%s3604_s0 + $0x18] sm:$0xff]  ;;  %vm158_vm4 = vcmask 1043456  }
  0x15   :  { %v70_v4 = vrot.slane %v61_v1, 6  ;;  %v72_v6 = vrot.slane %v62_v2, 6  ;;  %v73_v7 = vrot.slane %v63_v5, 6  ;;  %v2699_v20 = vld [vmem:[%s3605_s1] sm:$0xff]   ;;  %s2928_s15 = smov 4   ;;  %s2930_s16 = smov 16  }
  0x16   :  { %v3038_v9 = vsel %vm68_vm0, 0.0, %v69_v3  ;;  %2556 = vmatprep.subr.bf16.mxu0 %v2699_v20  ;;  %v2700_v37 = vld [vmem:[%s3605_s1 + $0x8] ss:$0 sps:$4 sm:$0x33]   ;;  %s2929_s1 = smov 12   ;;  %vm181_vm5 = vcmask 31744  }
  0x17   :  { %v3035_v8 = vsel %vm68_vm0, %v69_v3, %v70_v4  ;;  %v3041_v10 = vsel %vm68_vm0, %v70_v4, 0.0  ;;  %v3044_v11 = vsel %vm68_vm0, 0.0, %v72_v6  ;;  %v113_v12 = vrot.slane %v3038_v9, 2  ;;  %2557 = vmatpush3.bf16.msra.mxu0 %v2699_v20  ;;  %s2933_s18 = smov 32  }
  0x18   :  { %v114_v13 = vrot.slane %v3035_v8, 2  ;;  %v116_v14 = vrot.slane %v3041_v10, 2  ;;  %v90_v15 = vrot.slane %v3038_v9, 1  ;;  %v91_v16 = vrot.slane %v3035_v8, 1  ;;  %2604 = vmatprep.subr.msk.bf16.mxu0 %vm68_vm0, %v2700_v37 }
  0x19   :  { %v93_v17 = vrot.slane %v3041_v10, 1  ;;  %v3053_v18 = vsel %vm68_vm0, %v72_v6, %v73_v7  ;;  %v84_v19 = vsel %vm68_vm0, %v73_v7, 0.0  ;;  %v118_v23 = vrot.slane %v3044_v11, 2 }
  0x1a   :  { %v115_v21 = vsel %vm112_vm1, %v113_v12, %v114_v13  ;;  %v117_v22 = vsel %vm112_vm1, %v114_v13, %v116_v14  ;;  %v119_v24 = vrot.slane %v3053_v18, 2  ;;  %v92_v26 = vsel %vm89_vm2, %v90_v15, %v91_v16 }
  0x1b   :  { %v2629_v25 = vpack.i.bf16 %v117_v22, %v115_v21  ;;  %v94_v27 = vsel %vm89_vm2, %v91_v16, %v93_v17  ;;  %v121_v28 = vrot.slane %v84_v19, 2  ;;  %v95_v31 = vrot.slane %v3044_v11, 1 }
  0x1c   :  { %v2619_v29 = vpack.i.bf16 %v94_v27, %v92_v26  ;;  %v120_v30 = vsel %vm112_vm1, %v118_v23, %v119_v24  ;;  %v96_v32 = vrot.slane %v3053_v18, 1  ;;  %v98_v34 = vrot.slane %v84_v19, 1 }
  0x1d   :  { %2630 = vrot.lane.b32.xlu1 %v2629_v25, %s2927_s19  ;;  %v122_v33 = vsel %vm112_vm1, %v119_v24, %v121_v28  ;;  %v141_v35 = vrot.slane %v3044_v11, 3  ;;  %v142_v36 = vrot.slane %v3053_v18, 3  ;;  %v144_v40 = vrot.slane %v84_v19, 3 }
  0x1e   :  { %2620 = vrot.lane.b32.xlu0 %v2619_v29, %s2928_s15  ;;  %v2634_v38 = vpack.i.bf16 %v122_v33, %v120_v30  ;;  %v97_v39 = vsel %vm89_vm2, %v95_v31, %v96_v32  ;;  %v136_v41 = vrot.slane %v3038_v9, 3  ;;  %v99_v42 = vsel %vm89_vm2, %v96_v32, %v98_v34 }
  0x1f   :  { %v143_v43 = vsel %vm135_vm3, %v141_v35, %v142_v36  ;;  %v137_v44 = vrot.slane %v3035_v8, 3  ;;  %v139_v45 = vrot.slane %v3041_v10, 3  ;;  %v2624_v46 = vpack.i.bf16 %v99_v42, %v97_v39 }
  0x20   :  { %v145_v47 = vsel %vm135_vm3, %v142_v36, %v144_v40  ;;  %v164_v48 = vrot.slane %v3044_v11, 4  ;;  %v165_v49 = vrot.slane %v3053_v18, 4  ;;  %v167_v53 = vrot.slane %v84_v19, 4 }
  0x21   :  { %2635 = vrot.lane.b32.xlu1 %v2634_v38, %s2927_s19  ;;  %v2644_v50 = vpack.i.bf16 %v145_v47, %v143_v43  ;;  %v138_v51 = vsel %vm135_vm3, %v136_v41, %v137_v44  ;;  %v140_v52 = vsel %vm135_vm3, %v137_v44, %v139_v45  ;;  %v159_v56 = vrot.slane %v3038_v9, 4  ;;  %v2701_v43 = vld [vmem:[%s3607_s3] sm:$0xff]   ;;  %v2702_v45 = vld [vmem:[%s3607_s3 + $0x8] sm:$0xff]   ;;  %v2704_v47 = vld [vmem:[%s3607_s3 + $0x18] sm:$0xff]   ;;  %s2934_s19 = smov 96  }
  0x22   :  { %2625 = vrot.lane.b32.xlu0 %v2624_v46, %s2928_s15  ;;  %v2639_v54 = vpack.i.bf16 %v140_v52, %v138_v51  ;;  %v166_v55 = vsel %vm158_vm4, %v164_v48, %v165_v49  ;;  %v160_v57 = vrot.slane %v3035_v8, 4  ;;  %v168_v58 = vsel %vm158_vm4, %v165_v49, %v167_v53  ;;  %v2703_v46 = vld [vmem:[%s3607_s3 + $0x10] sm:$0xff]   ;;  %v2705_v48 = vld [vmem:[%s3607_s3 + $0x20] sm:$0xff]   ;;  %v2706_v49 = vld [vmem:[%s3607_s3 + $0x28] sm:$0xff]  }
  0x23   :  { %v162_v59 = vrot.slane %v3041_v10, 4  ;;  %v230_v61 = vsel %vm68_vm0, %v2700_v37, 0  ;;  %v2654_v62 = vpack.i.bf16 %v168_v58, %v166_v55  ;;  %vm186_vm6 = vcmask 64512   ;;  %v2708_v51 = vld [vmem:[%s3607_s3 + $0x38] sm:$0xff]   ;;  %v2346_v52 = vld [vmem:[%s3606_s2] ss:$0 sm:$0xff] }
  0x24   :  { %v161_v60 = vsel %vm158_vm4, %v159_v56, %v160_v57  ;;  %2559 = vmatpush3.bf16.msra.mxu0 %v230_v61  ;;  %vm191_vm7 = vcmask 97280   ;;  %vm196_vm8 = vcmask 130048   ;;  %vm222_vm9 = vcmask 162816  }
  0x25   :  { %2645 = vrot.lane.b32.xlu1 %v2644_v50, %s2929_s1  ;;  %v163_v63 = vsel %vm158_vm4, %v160_v57, %v162_v59  ;;  %v2931_v44 = vmov 0   ;;  %v2707_v50 = vld [vmem:[%s3607_s3 + $0x30] sm:$0xff]   ;;  %vm389_vm10 = vcmask 261120   ;;  %vm394_vm11 = vcmask 523264  }
  0x26   :  { %2640 = vrot.lane.b32.xlu0 %v2639_v54, %s2929_s1  ;;  %v2649_v0 = vpack.i.bf16 %v163_v63, %v161_v60  ;;  %501 = vmatprep.subr.bf16.mxu0 %v2931_v44  ;;  %vm399_vm12 = vcmask 785408   ;;  %vm642_vm13 = vcmask 517120   ;;  %vm771_vm14 = vcmask 1043459  }
  0x27   :  { %vm773_vm15 = vcmask 1044484  }
  0x29   :  { %2655 = vrot.lane.b32.xlu1 %v2654_v62, %s2930_s16 }
  0x2a   :  { %2650 = vrot.lane.b32.xlu0 %v2649_v0, %s2930_s16 }
  0x8f   :  { %v2631_v1 = vpop.permute.xlu1 %2630 }
  0x90   :  { %v2621_v2 = vpop.permute.xlu0 %2620  ;;  %v2633_v12 = vunpack.i.h.bf16 %v2631_v1  ;;  %v2632_v13 = vunpack.i.l.bf16 %v2631_v1 }
  0x91   :  { %v2623_v4 = vunpack.i.h.bf16 %v2621_v2  ;;  %v2622_v5 = vunpack.i.l.bf16 %v2621_v2 }
  0x93   :  { %v2636_v3 = vpop.permute.xlu1 %2635  ;;  %v183_v15 = vsel %vm181_vm5, %v3035_v8, %v2623_v4  ;;  %v182_v16 = vsel %vm181_vm5, %v3038_v9, %v2622_v5 }
  0x94   :  { %v2626_v6 = vpop.permute.xlu0 %2625  ;;  %v2638_v17 = vunpack.i.h.bf16 %v2636_v3  ;;  %v2637_v19 = vunpack.i.l.bf16 %v2636_v3  ;;  %v187_v28 = vsel %vm186_vm6, %v182_v16, %v2632_v13  ;;  %v188_v8 = vsel %vm186_vm6, %v183_v15, %v2633_v12 }
  0x95   :  { %v2628_v7 = vunpack.i.h.bf16 %v2626_v6  ;;  %v2627_v10 = vunpack.i.l.bf16 %v2626_v6  ;;  %v2709_v6 = vld [vmem:[%s3607_s3 + $0x40] sm:$0xff]  }
  0x97   :  { %v2646_v14 = vpop.permute.xlu1 %2645  ;;  %v185_v21 = vsel %vm181_vm5, %v3053_v18, %v2628_v7  ;;  %v184_v22 = vsel %vm181_vm5, %v3044_v11, %v2627_v10  ;;  %vm775_vm5 = vcmask 1045509  }
  0x98   :  { %v2641_v20 = vpop.permute.xlu0 %2640  ;;  %v2648_v23 = vunpack.i.h.bf16 %v2646_v14  ;;  %v2647_v24 = vunpack.i.l.bf16 %v2646_v14  ;;  %v189_v9 = vsel %vm186_vm6, %v184_v22, %v2637_v19  ;;  %v190_v29 = vsel %vm186_vm6, %v185_v21, %v2638_v17 }
  0x99   :  { %v2643_v25 = vunpack.i.h.bf16 %v2641_v20  ;;  %v2642_v26 = vunpack.i.l.bf16 %v2641_v20  ;;  %vm777_vm6 = vcmask 1046534  }
  0x9a   :  { %v194_v11 = vsel %vm191_vm7, %v189_v9, %v2647_v24  ;;  %v195_v32 = vsel %vm191_vm7, %v190_v29, %v2648_v23 }
  0x9b   :  { %v2656_v27 = vpop.permute.xlu1 %2655  ;;  %v192_v37 = vsel %vm191_vm7, %v187_v28, %v2642_v26  ;;  %v193_v38 = vsel %vm191_vm7, %v188_v8, %v2643_v25  ;;  %vm779_vm7 = vcmask 1047559  }
  0x9c   :  { %v2658_v30 = vunpack.i.h.bf16 %v2656_v27  ;;  %v2657_v31 = vunpack.i.l.bf16 %v2656_v27  ;;  %v2651_v18 = vpop.permute.xlu0 %2650  ;;  %v2710_v27 = vld [vmem:[%s3607_s3 + $0x48] sm:$0xff]   ;;  %s2932_s3 = smov 64  }
  0x9d   :  { %v2653_v33 = vunpack.i.h.bf16 %v2651_v18  ;;  %v2652_v34 = vunpack.i.l.bf16 %v2651_v18 }
  0x9e   :  { %v199_v35 = vsel %vm196_vm8, %v194_v11, %v2657_v31  ;;  %v200_v36 = vsel %vm196_vm8, %v195_v32, %v2658_v30 }
  0x9f   :  { %v202_v39 = vpack.c.bf16 %v200_v36, %v199_v35  ;;  %v197_v40 = vsel %vm196_vm8, %v192_v37, %v2652_v34  ;;  %v198_v41 = vsel %vm196_vm8, %v193_v38, %v2653_v33  ;;  %vm781_vm8 = vcmask 1041409  }
  0xa0   :  { %v201_v42 = vpack.c.bf16 %v198_v41, %v197_v40 }
  0xa2   :  { %2560 = vmatprep.mubr.msk.bf16.mxu0 %vm222_vm9, %v201_v42 }
  0xa3   :  { %2561 = vmatmul.mubr.msk.bf16.vlgmr.msra.gmra.mrb[0].mxu0 %vm222_vm9, %v202_v39  ;;  %vm2937_vm9 = vmmov 0  }
  0xa4   :  { %502 = vmatpush1.bf16.msra.mxu0 %v2701_v43 }
  0xa5   :  { %503 = vmatprep.subr.bf16.mxu0 %v2931_v44 }
  0xa8   :  { %504 = vmatpush1.bf16.msra.mxu0 %v2702_v45 }
  0xa9   :  { %505 = vmatprep.subr.bf16.mxu0 %v2931_v44 }
  0xac   :  { %506 = vmatpush1.bf16.msra.mxu0 %v2703_v46 }
  0xad   :  { %507 = vmatprep.subr.bf16.mxu0 %v2931_v44 }
  0xb0   :  { %508 = vmatpush1.bf16.msra.mxu0 %v2704_v47 }
  0xb1   :  { %509 = vmatprep.subr.bf16.mxu0 %v2931_v44 }
  0xb4   :  { %510 = vmatpush1.bf16.msra.mxu0 %v2705_v48 }
  0xb5   :  { %511 = vmatprep.subr.bf16.mxu0 %v2931_v44 }
  0xb8   :  { %512 = vmatpush1.bf16.msra.mxu0 %v2706_v49 }
  0xb9   :  { %513 = vmatprep.subr.bf16.mxu0 %v2931_v44 }
  0xbc   :  { %514 = vmatpush1.bf16.msra.mxu0 %v2707_v50 }
  0xbd   :  { %515 = vmatprep.subr.bf16.mxu0 %v2931_v44 }
  0xc0   :  { %516 = vmatpush1.bf16.msra.mxu0 %v2708_v51 }
  0xc1   :  { %517 = vmatprep.subr.bf16.mxu0 %v2931_v44 }
  0xc4   :  { %518 = vmatpush1.bf16.msra.mxu0 %v2709_v6 }
  0xc5   :  { %519 = vmatprep.subr.bf16.mxu0 %v2931_v44 }
  0xc8   :  { %520 = vmatpush1.bf16.msra.mxu0 %v2710_v27 }
 0x176   :  { %v2562_v53 = vpop.f32.mrb[0].mxu0 }
 0x177   :  { %v275_v54 = vadd.f32 %v2562_v53, %v2346_v52  ;;  %v266_v55 = vpop.f32.mrb[1].mxu0 }
 0x178   :  { %v267_v56 = vadd.f32 %v2346_v52, %v266_v55  ;;  %v2563_v57 = vpop.f32.mrb[2].mxu0 }
 0x179   :  { %v283_v58 = vmax.f32 %v275_v54, 0.0  ;;  %v278_v59 = vadd.f32 %v2563_v57, %v2346_v52  ;;  %v269_v60 = vpop.f32.mrb[3].mxu0 }
 0x17a   :  { %v281_v61 = vmax.f32 %v267_v56, 0.0  ;;  %v270_v62 = vadd.f32 %v2346_v52, %v269_v60 }
 0x17b   :  { %v284_v63 = vmax.f32 %v278_v59, 0.0  ;;  %v292_v0 = vrot.slane %v283_v58, 6 }
 0x17c   :  { %v289_v1 = vrot.slane %v281_v61, 6  ;;  %v282_v2 = vmax.f32 %v270_v62, 0.0 }
 0x17d   :  { %v293_v3 = vrot.slane %v284_v63, 6  ;;  %v3161_v12 = vsel %vm68_vm0, 0.0, %v292_v0 }
 0x17e   :  { %v3149_v4 = vsel %vm68_vm0, 0.0, %v289_v1  ;;  %v290_v5 = vrot.slane %v282_v2, 6  ;;  %v314_v9 = vrot.slane %v3161_v12, 1  ;;  %v358_v45 = vrot.slane %v3161_v12, 3 }
 0x17f   :  { %v3155_v7 = vsel %vm68_vm0, %v292_v0, %v293_v3  ;;  %v3158_v10 = vsel %vm68_vm0, %v293_v3, 0.0  ;;  %v375_v13 = vrot.slane %v3149_v4, 4  ;;  %v331_v17 = vrot.slane %v3149_v4, 2 }
 0x180   :  { %v317_v14 = vrot.slane %v3158_v10, 1  ;;  %v3166_v15 = vsel %vm68_vm0, %v289_v1, %v290_v5  ;;  %v303_v16 = vsel %vm68_vm0, %v290_v5, 0.0  ;;  %v309_v22 = vrot.slane %v3149_v4, 1 }
 0x181   :  { %v312_v19 = vrot.slane %v303_v16, 1  ;;  %v334_v20 = vrot.slane %v303_v16, 2  ;;  %v376_v21 = vrot.slane %v3166_v15, 4  ;;  %v378_v23 = vrot.slane %v303_v16, 4 }
 0x182   :  { %v332_v24 = vrot.slane %v3166_v15, 2  ;;  %v310_v25 = vrot.slane %v3166_v15, 1  ;;  %v315_v26 = vrot.slane %v3155_v7, 1  ;;  %v356_v28 = vrot.slane %v303_v16, 3 }
 0x183   :  { %v377_v8 = vsel %vm158_vm4, %v375_v13, %v376_v21  ;;  %v354_v29 = vrot.slane %v3166_v15, 3  ;;  %v379_v30 = vsel %vm158_vm4, %v376_v21, %v378_v23  ;;  %v353_v35 = vrot.slane %v3149_v4, 3 }
 0x184   :  { %v333_v31 = vsel %vm112_vm1, %v331_v17, %v332_v24  ;;  %v335_v18 = vsel %vm112_vm1, %v332_v24, %v334_v20  ;;  %v311_v11 = vsel %vm89_vm2, %v309_v22, %v310_v25  ;;  %v405_v32 = vpack.c.bf16 %v379_v30, %v377_v8 }
 0x185   :  { %v2664_v33 = vpack.i.bf16 %v335_v18, %v333_v31  ;;  %v313_v34 = vsel %vm89_vm2, %v310_v25, %v312_v19  ;;  %v361_v36 = vrot.slane %v3158_v10, 3  ;;  %v316_v38 = vsel %vm89_vm2, %v314_v9, %v315_v26 }
 0x186   :  { %v2659_v37 = vpack.i.bf16 %v313_v34, %v311_v11  ;;  %v318_v39 = vsel %vm89_vm2, %v315_v26, %v317_v14  ;;  %v339_v40 = vrot.slane %v3158_v10, 2  ;;  %2362 = vmatprep.mubr.msk.bf16.mxu0 %vm389_vm10, %v405_v32  ;;  %v355_v41 = vsel %vm135_vm3, %v353_v35, %v354_v29  ;;  %v2713_v32 = vld [vmem:[%s3609_s5 + $0x48] sm:$0xff]   ;;  %v2715_v34 = vld [vmem:[%s3609_s5 + $0x50] sm:$0xff]  }
 0x187   :  { %2665 = vrot.lane.b32.xlu1 %v2664_v33, %s2932_s3  ;;  %v357_v42 = vsel %vm135_vm3, %v354_v29, %v356_v28  ;;  %v359_v43 = vrot.slane %v3155_v7, 3  ;;  %v337_v46 = vrot.slane %v3155_v7, 2  ;;  %v2674_v47 = vpack.i.bf16 %v318_v39, %v316_v38  ;;  %v2714_v33 = vld [vmem:[%s3609_s5 + $0x8] sm:$0xff]   ;;  %v2716_v35 = vld [vmem:[%s3609_s5 + $0x10] sm:$0xff]   ;;  %v2719_v38 = vld [vmem:[%s3609_s5 + $0x60] sm:$0xff]  }
 0x188   :  { %2660 = vrot.lane.b32.xlu0 %v2659_v37, %s2933_s18  ;;  %v336_v48 = vrot.slane %v3161_v12, 2  ;;  %v2669_v49 = vpack.i.bf16 %v357_v42, %v355_v41  ;;  %v381_v58 = vrot.slane %v3155_v7, 4  ;;  %v383_v59 = vrot.slane %v3158_v10, 4  ;;  %v2718_v37 = vld [vmem:[%s3609_s5 + $0x18] sm:$0xff]   ;;  %v2720_v39 = vld [vmem:[%s3609_s5 + $0x20] sm:$0xff]   ;;  %v2722_v41 = vld [vmem:[%s3609_s5 + $0x28] sm:$0xff]  }
 0x189   :  { %v360_v50 = vsel %vm135_vm3, %v358_v45, %v359_v43  ;;  %v362_v51 = vsel %vm135_vm3, %v359_v43, %v361_v36  ;;  %v340_v53 = vsel %vm112_vm1, %v337_v46, %v339_v40  ;;  %v380_v0 = vrot.slane %v3161_v12, 4  ;;  %v2717_v36 = vld [vmem:[%s3609_s5 + $0x58] sm:$0xff]   ;;  %v2721_v40 = vld [vmem:[%s3609_s5 + $0x68] sm:$0xff]   ;;  %v2723_v42 = vld [vmem:[%s3609_s5 + $0x70] sm:$0xff]  }
 0x18a   :  { %v338_v52 = vsel %vm112_vm1, %v336_v48, %v337_v46  ;;  %v2684_v54 = vpack.i.bf16 %v362_v51, %v360_v50  ;;  %v384_v14 = vsel %vm158_vm4, %v381_v58, %v383_v59  ;;  %v2724_v43 = vld [vmem:[%s3609_s5 + $0x30] sm:$0xff]   ;;  %v2935_v45 = vmov 1983009808   ;;  %v3274_v50 = vld [vmem:[%s3608_s4] ss:$0 sm:$0xff] }
 0x18b   :  { %2675 = vrot.lane.b32.xlu1 %v2674_v47, %s2933_s18  ;;  %v2679_v55 = vpack.i.bf16 %v340_v53, %v338_v52  ;;  %v382_v10 = vsel %vm158_vm4, %v380_v0, %v381_v58  ;;  %v560_v46 = vunpack.c.l.s4 %v2935_v45  ;;  %v562_v47 = vlaneseq }
 0x18c   :  { %2670 = vrot.lane.b32.xlu0 %v2669_v49, %s2934_s19  ;;  %v407_v24 = vpack.c.bf16 %v384_v14, %v382_v10 }
 0x18d   :  { %v561_v48 = vunpack.c.0.s8 %v560_v46  ;;  %v3269_v49 = vshrl.u32 %v562_v47, 7 }
 0x18f   :  { %2685 = vrot.lane.b32.xlu1 %v2684_v54, %s2934_s19  ;;  %v3278_v53 = vsub.s32 %v561_v48, %v3269_v49 }
 0x190   :  { %2680 = vrot.lane.b32.xlu0 %v2679_v55, %s2932_s3 }
 0x1f9   :  { %v2666_v56 = vpop.permute.xlu1 %2665 }
 0x1fa   :  { %v2661_v57 = vpop.permute.xlu0 %2660  ;;  %v2668_v62 = vunpack.i.h.bf16 %v2666_v56  ;;  %v2667_v63 = vunpack.i.l.bf16 %v2666_v56 }
 0x1fb   :  { %v2663_v60 = vunpack.i.h.bf16 %v2661_v57  ;;  %v2662_v61 = vunpack.i.l.bf16 %v2661_v57 }
 0x1fd   :  { %v391_v1 = vsel %vm389_vm10, %v3166_v15, %v2663_v60  ;;  %v390_v2 = vsel %vm389_vm10, %v3149_v4, %v2662_v61  ;;  %v2676_v3 = vpop.permute.xlu1 %2675 }
 0x1fe   :  { %v2671_v5 = vpop.permute.xlu0 %2670  ;;  %v2678_v16 = vunpack.i.h.bf16 %v2676_v3  ;;  %v2677_v17 = vunpack.i.l.bf16 %v2676_v3  ;;  %v395_v19 = vsel %vm394_vm11, %v390_v2, %v2667_v63  ;;  %v396_v20 = vsel %vm394_vm11, %v391_v1, %v2668_v62 }
 0x1ff   :  { %v2673_v6 = vunpack.i.h.bf16 %v2671_v5  ;;  %v2672_v13 = vunpack.i.l.bf16 %v2671_v5 }
 0x200   :  { %v393_v8 = vsel %vm389_vm10, %v3155_v7, %v2678_v16  ;;  %v392_v9 = vsel %vm389_vm10, %v3161_v12, %v2677_v17  ;;  %v2711_v7 = vld [vmem:[%s3609_s5 + $0x40] sm:$0xff]  }
 0x201   :  { %v400_v15 = vsel %vm399_vm12, %v395_v19, %v2672_v13  ;;  %v401_v4 = vsel %vm399_vm12, %v396_v20, %v2673_v6  ;;  %v2686_v21 = vpop.permute.xlu1 %2685  ;;  %v2712_v12 = vld [vmem:[%s3609_s5] sm:$0xff]   ;;  %2500 = vmatprep.subr.bf16.mxu0 %v2711_v7 }
 0x202   :  { %v404_v22 = vpack.c.bf16 %v401_v4, %v400_v15  ;;  %v2681_v23 = vpop.permute.xlu0 %2680  ;;  %v2688_v25 = vunpack.i.h.bf16 %v2686_v21  ;;  %v2687_v26 = vunpack.i.l.bf16 %v2686_v21 }
 0x203   :  { %v2683_v27 = vunpack.i.h.bf16 %v2681_v23  ;;  %v2682_v28 = vunpack.i.l.bf16 %v2681_v23 }
 0x204   :  { %534 = vmatmul.mubr.bf16.vlgmr.msra.gmra.mrb[4].mxu0 %v404_v22 }
 0x205   :  { %v398_v29 = vsel %vm394_vm11, %v393_v8, %v2683_v27  ;;  %v397_v30 = vsel %vm394_vm11, %v392_v9, %v2682_v28  ;;  %2363 = vmatprep.mubr.msk.bf16.mxu0 %vm389_vm10, %v407_v24  ;;  %2501 = vmatpush3.bf16.msra.mxu0 %v2712_v12  ;;  %vm3405_vm10 = vmneg %vm68_vm0 }
 0x206   :  { %v402_v31 = vsel %vm399_vm12, %v397_v30, %v2687_v26  ;;  %v403_v18 = vsel %vm399_vm12, %v398_v29, %v2688_v25  ;;  %2502 = vmatprep.subr.bf16.mxu0 %v2713_v32 }
 0x207   :  { %v406_v11 = vpack.c.bf16 %v403_v18, %v402_v31 }
 0x209   :  { %2503 = vmatpush3.bf16.msra.mxu0 %v2714_v33 }
 0x20a   :  { %2504 = vmatprep.subr.bf16.mxu0 %v2715_v34 }
 0x20c   :  { %542 = vmatmul.mubr.bf16.gmra.mrb[8].mxu0 %v406_v11 }
 0x20d   :  { %2505 = vmatpush3.bf16.msra.mxu0 %v2716_v35 }
 0x20e   :  { %2506 = vmatprep.subr.bf16.mxu0 %v2717_v36 }
 0x211   :  { %2507 = vmatpush3.bf16.msra.mxu0 %v2718_v37 }
 0x212   :  { %2508 = vmatprep.subr.bf16.mxu0 %v2719_v38 }
 0x215   :  { %2509 = vmatpush3.bf16.msra.mxu0 %v2720_v39 }
 0x216   :  { %2510 = vmatprep.subr.bf16.mxu0 %v2721_v40 }
 0x219   :  { %2511 = vmatpush3.bf16.msra.mxu0 %v2722_v41 }
 0x21a   :  { %2512 = vmatprep.subr.bf16.mxu0 %v2723_v42 }
 0x21d   :  { %2513 = vmatpush3.bf16.msra.mxu0 %v2724_v43 }
 0x2d7   :  { %v535_v51 = vpop.f32.mrb[4].mxu0 }
 0x2d8   :  { %v536_v52 = vadd.f32 %v3274_v50, %v535_v51  ;;  %v537_v54 = vpop.f32.mrb[5].mxu0 }
 0x2d9   :  { %v538_v55 = vpop.f32.mrb[6].mxu0 }
 0x2da   :  { %v550_v56 = vmax.f32 %v536_v52, 0.0  ;;  %v539_v57 = vadd.f32 %v3274_v50, %v538_v55  ;;  %v540_v58 = vpop.f32.mrb[7].mxu0 }
 0x2dc   :  { %v558_v59 = vcombine.high %v550_v56, %v550_v56  ;;  %v565_v60 = vrot.slane %v550_v56, %v3278_v53  ;;  %v551_v61 = vmax.f32 %v539_v57, 0.0 }
 0x2de   :  { %v572_v62 = vrot.slane %v558_v59, %v3278_v53  ;;  %v573_v63 = vcombine.high %v565_v60, %v565_v60  ;;  %v643_v0 = vsel %vm642_vm13, %v565_v60, -inf  ;;  %v575_v1 = vcombine.high %v551_v61, %v551_v61 }
 0x2df   :  { %v644_v2 = vrot.slane %v643_v0, 4  ;;  %v582_v3 = vrot.slane %v551_v61, %v3278_v53  ;;  %v543_v5 = vpop.f32.mrb[8].mxu0 }
 0x2e0   :  { %v574_v6 = vcombine.high %v572_v62, %v572_v62  ;;  %v650_v13 = vsel %vm642_vm13, %v573_v63, -inf  ;;  %v657_v10 = vsel %vm642_vm13, %v572_v62, -inf  ;;  %v589_v14 = vrot.slane %v575_v1, %v3278_v53  ;;  %v545_v16 = vpop.f32.mrb[9].mxu0 }
 0x2e1   :  { %v645_v17 = vmax.f32 %v643_v0, %v644_v2  ;;  %v651_v19 = vrot.slane %v650_v13, 4  ;;  %v658_v20 = vrot.slane %v657_v10, 4  ;;  %v590_v15 = vcombine.high %v582_v3, %v582_v3  ;;  %v546_v4 = vpop.f32.mrb[10].mxu0 }
 0x2e2   :  { %v664_v21 = vsel %vm642_vm13, %v574_v6, -inf  ;;  %v591_v22 = vcombine.high %v589_v14, %v589_v14  ;;  %v671_v23 = vsel %vm642_vm13, %v582_v3, -inf  ;;  %v685_v24 = vsel %vm642_vm13, %v589_v14, -inf  ;;  %v548_v25 = vpop.f32.mrb[11].mxu0 }
 0x2e3   :  { %v646_v26 = vrot.slane %v645_v17, 2  ;;  %v652_v27 = vmax.f32 %v650_v13, %v651_v19  ;;  %v659_v28 = vmax.f32 %v657_v10, %v658_v20  ;;  %v665_v8 = vrot.slane %v664_v21, 4 }
 0x2e4   :  { %v672_v9 = vrot.slane %v671_v23, 4  ;;  %v678_v29 = vsel %vm642_vm13, %v590_v15, -inf  ;;  %v686_v30 = vrot.slane %v685_v24, 4  ;;  %v692_v31 = vsel %vm642_vm13, %v591_v22, -inf }
 0x2e5   :  { %v647_v18 = vmax.f32 %v645_v17, %v646_v26  ;;  %v653_v11 = vrot.slane %v652_v27, 2  ;;  %v660_v7 = vrot.slane %v659_v28, 2  ;;  %v666_v12 = vmax.f32 %v664_v21, %v665_v8 }
 0x2e6   :  { %v673_v32 = vmax.f32 %v671_v23, %v672_v9  ;;  %v679_v33 = vrot.slane %v678_v29, 4  ;;  %v687_v34 = vmax.f32 %v685_v24, %v686_v30  ;;  %v693_v35 = vrot.slane %v692_v31, 4 }
 0x2e7   :  { %v648_v36 = vrot.slane %v647_v18, 1  ;;  %v654_v37 = vmax.f32 %v652_v27, %v653_v11  ;;  %v661_v38 = vmax.f32 %v659_v28, %v660_v7  ;;  %v667_v39 = vrot.slane %v666_v12, 2 }
 0x2e8   :  { %v674_v40 = vrot.slane %v673_v32, 2  ;;  %v680_v41 = vmax.f32 %v678_v29, %v679_v33  ;;  %v688_v42 = vrot.slane %v687_v34, 2  ;;  %v694_v43 = vmax.f32 %v692_v31, %v693_v35 }
 0x2e9   :  { %v649_v45 = vmax.f32 %v647_v18, %v648_v36  ;;  %v655_v46 = vrot.slane %v654_v37, 1  ;;  %v662_v47 = vrot.slane %v661_v38, 1  ;;  %v668_v48 = vmax.f32 %v666_v12, %v667_v39 }
 0x2ea   :  { %v675_v51 = vmax.f32 %v673_v32, %v674_v40  ;;  %v681_v52 = vrot.slane %v680_v41, 2  ;;  %v689_v54 = vmax.f32 %v687_v34, %v688_v42  ;;  %v695_v55 = vrot.slane %v694_v43, 2 }
 0x2eb   :  { %v656_v56 = vmax.f32 %v654_v37, %v655_v46  ;;  %v663_v57 = vmax.f32 %v661_v38, %v662_v47  ;;  %v669_v58 = vrot.slane %v668_v48, 1  ;;  %v544_v59 = vadd.f32 %v3274_v50, %v543_v5 }
 0x2ec   :  { %v676_v60 = vrot.slane %v675_v51, 1  ;;  %v682_v61 = vmax.f32 %v680_v41, %v681_v52  ;;  %v696_v62 = vmax.f32 %v694_v43, %v695_v55  ;;  %v547_v2 = vadd.f32 %v3274_v50, %v546_v4 }
 0x2ed   :  { %v670_v63 = vmax.f32 %v668_v48, %v669_v58  ;;  %v772_v0 = vsel %vm771_vm14, %v656_v56, %v649_v45  ;;  %v552_v1 = vmax.f32 %v544_v59, 0.0  ;;  %v690_v10 = vrot.slane %v689_v54, 1 }
 0x2ee   :  { %v774_v3 = vsel %vm773_vm15, %v663_v57, %v772_v0  ;;  %v677_v6 = vmax.f32 %v675_v51, %v676_v60  ;;  %v683_v13 = vrot.slane %v682_v61, 1  ;;  %v553_v20 = vmax.f32 %v547_v2, 0.0 }
 0x2ef   :  { %v776_v14 = vsel %vm775_vm5, %v670_v63, %v774_v3  ;;  %v592_v16 = vcombine.high %v552_v1, %v552_v1  ;;  %v599_v5 = vrot.slane %v552_v1, %v3278_v53  ;;  %v697_v15 = vrot.slane %v696_v62, 1 }
 0x2f0   :  { %v684_v17 = vmax.f32 %v682_v61, %v683_v13  ;;  %v778_v19 = vsel %vm777_vm6, %v677_v6, %v776_v14  ;;  %v609_v24 = vcombine.high %v553_v20, %v553_v20  ;;  %v616_v25 = vrot.slane %v553_v20, %v3278_v53 }
 0x2f1   :  { %v606_v21 = vrot.slane %v592_v16, %v3278_v53  ;;  %v607_v22 = vcombine.high %v599_v5, %v599_v5  ;;  %v699_v50 = vsel %vm642_vm13, %v599_v5, -inf  ;;  %v691_v26 = vmax.f32 %v689_v54, %v690_v10 }
 0x2f2   :  { %v780_v4 = vsel %vm779_vm7, %v684_v17, %v778_v19  ;;  %v700_v23 = vrot.slane %v699_v50, 4  ;;  %v623_v31 = vrot.slane %v609_v24, %v3278_v53  ;;  %v698_v18 = vmax.f32 %v696_v62, %v697_v15 }
 0x2f3   :  { %v608_v27 = vcombine.high %v606_v21, %v606_v21  ;;  %v706_v28 = vsel %vm642_vm13, %v607_v22, -inf  ;;  %v713_v8 = vsel %vm642_vm13, %v606_v21, -inf  ;;  %v624_v7 = vcombine.high %v616_v25, %v616_v25 }
 0x2f4   :  { %v701_v9 = vmax.f32 %v699_v50, %v700_v23  ;;  %v707_v29 = vrot.slane %v706_v28, 4  ;;  %v714_v30 = vrot.slane %v713_v8, 4  ;;  %v727_v12 = vsel %vm642_vm13, %v616_v25, -inf }
 0x2f5   :  { %v720_v11 = vsel %vm642_vm13, %v608_v27, -inf  ;;  %v625_v36 = vcombine.high %v623_v31, %v623_v31  ;;  %v728_v37 = vrot.slane %v727_v12, 4  ;;  %v734_v38 = vsel %vm642_vm13, %v624_v7, -inf }
 0x2f6   :  { %v702_v32 = vrot.slane %v701_v9, 2  ;;  %v708_v33 = vmax.f32 %v706_v28, %v707_v29  ;;  %v715_v34 = vmax.f32 %v713_v8, %v714_v30  ;;  %v721_v35 = vrot.slane %v720_v11, 4  ;;  %v2725_v28 = vld [vmem:[%s3609_s5 + $0x78] sm:$0xff]  }
 0x2f7   :  { %v741_v39 = vsel %vm642_vm13, %v623_v31, -inf  ;;  %v729_v45 = vmax.f32 %v727_v12, %v728_v37  ;;  %v735_v46 = vrot.slane %v734_v38, 4  ;;  %v748_v48 = vsel %vm642_vm13, %v625_v36, -inf  ;;  %v2726_v29 = vld [vmem:[%s3609_s5 + $0x38] sm:$0xff]   ;;  %2514 = vmatprep.subr.bf16.mxu0 %v2725_v28 }
 0x2f8   :  { %v703_v40 = vmax.f32 %v701_v9, %v702_v32  ;;  %v709_v41 = vrot.slane %v708_v33, 2  ;;  %v716_v42 = vrot.slane %v715_v34, 2  ;;  %v722_v43 = vmax.f32 %v720_v11, %v721_v35  ;;  %2515 = vmatpush3.bf16.msra.mxu0 %v2726_v29 }
 0x2f9   :  { %v742_v47 = vrot.slane %v741_v39, 4  ;;  %v730_v56 = vrot.slane %v729_v45, 2  ;;  %v736_v57 = vmax.f32 %v734_v38, %v735_v46  ;;  %v749_v59 = vrot.slane %v748_v48, 4 }
 0x2fa   :  { %v704_v51 = vrot.slane %v703_v40, 1  ;;  %v710_v52 = vmax.f32 %v708_v33, %v709_v41  ;;  %v717_v54 = vmax.f32 %v715_v34, %v716_v42  ;;  %v723_v55 = vrot.slane %v722_v43, 2 }
 0x2fb   :  { %v743_v58 = vmax.f32 %v741_v39, %v742_v47  ;;  %v782_v63 = vsel %vm781_vm8, %v698_v18, %v691_v26  ;;  %v731_v0 = vmax.f32 %v729_v45, %v730_v56  ;;  %v737_v1 = vrot.slane %v736_v57, 2 }
 0x2fc   :  { %v711_v60 = vrot.slane %v710_v52, 1  ;;  %v718_v61 = vrot.slane %v717_v54, 1  ;;  %v724_v62 = vmax.f32 %v722_v43, %v723_v55  ;;  %v750_v3 = vmax.f32 %v748_v48, %v749_v59  ;;  %v2733_v59 = vld [vmem:[#allocation2] ss:$8 sps:$4 sm:$0xff]  }
 0x2fd   :  { %v744_v2 = vrot.slane %v743_v58, 2  ;;  %v705_v6 = vmax.f32 %v703_v40, %v704_v51  ;;  %v732_v16 = vrot.slane %v731_v0, 1  ;;  %v738_v5 = vmax.f32 %v736_v57, %v737_v1  ;;  %v2742_v1 = vld [vmem:[#allocation2 + $0x30] ss:$8 sps:$4 sm:$0xff]  }
 0x2fe   :  { %v712_v13 = vmax.f32 %v710_v52, %v711_v60  ;;  %v719_v10 = vmax.f32 %v717_v54, %v718_v61  ;;  %v725_v14 = vrot.slane %v724_v62, 1  ;;  %v751_v19 = vrot.slane %v750_v3, 2  ;;  %v2734_v60 = vld [vmem:[#allocation2 + $0x14] ss:$8 sps:$4 sm:$0xff]   ;;  %v2736_v61 = vld [vmem:[#allocation2 + $0x10] ss:$8 sps:$4 sm:$0xff]  }
 0x2ff   :  { %v745_v17 = vmax.f32 %v743_v58, %v744_v2  ;;  %v733_v22 = vmax.f32 %v731_v0, %v732_v16  ;;  %v739_v50 = vrot.slane %v738_v5, 1  ;;  %v3316_v23 = vsel %vm68_vm0, 0.0, %v780_v4  ;;  %v2731_v58 = vld [vmem:[#allocation2 + $0x4] ss:$8 sps:$4 sm:$0xff]   ;;  %v2740_v0 = vld [vmem:[#allocation2 + $0x34] ss:$8 sps:$4 sm:$0xff]  }
 0x300   :  { %v726_v20 = vmax.f32 %v724_v62, %v725_v14  ;;  %v783_v15 = vsel %vm771_vm14, %v712_v13, %v705_v6  ;;  %v752_v25 = vmax.f32 %v750_v3, %v751_v19  ;;  %v3320_v27 = vsel %vm68_vm0, %v782_v63, 0.0  ;;  %1645 = vmatprep.subr.bf16.mxu1 %v2731_v58  ;;  %v2737_v62 = vld [vmem:[#allocation2 + $0x24] ss:$8 sps:$4 sm:$0xff]   ;;  %v2739_v63 = vld [vmem:[#allocation2 + $0x20] ss:$8 sps:$4 sm:$0xff]  }
 0x301   :  { %v784_v21 = vsel %vm773_vm15, %v719_v10, %v783_v15  ;;  %v746_v24 = vrot.slane %v745_v17, 1  ;;  %v740_v8 = vmax.f32 %v738_v5, %v739_v50  ;;  %v821_v31 = vrot.slane %v3316_v23, 3  ;;  %1646 = vmatpush1.bf16.msra.mxu1 %v2733_v59  ;;  %v2743_v2 = vld [vmem:[#allocation2 + $0x44] ss:$8 sps:$4 sm:$0xff]   ;;  %v2745_v3 = vld [vmem:[#allocation2 + $0x40] ss:$8 sps:$4 sm:$0xff]  }
 0x302   :  { %v785_v26 = vsel %vm775_vm5, %v726_v20, %v784_v21  ;;  %v753_v4 = vrot.slane %v752_v25, 1  ;;  %v822_v18 = vrot.slane %v3320_v27, 3  ;;  %v801_v32 = vrot.slane %v3316_v23, 1  ;;  %1647 = vmatprep.subr.bf16.mxu1 %v2734_v60  ;;  %v2746_v6 = vld [vmem:[#allocation2 + $0x54] ss:$8 sps:$4 sm:$0xff]  }
 0x303   :  { %v786_v9 = vsel %vm777_vm6, %v733_v22, %v785_v26  ;;  %v747_v11 = vmax.f32 %v745_v17, %v746_v24  ;;  %v802_v33 = vrot.slane %v3320_v27, 1  ;;  %v833_v34 = vrot.slane %v3316_v23, 4  ;;  %v2748_v13 = vld [vmem:[#allocation2 + $0x50] ss:$8 sps:$4 sm:$0xff]   ;;  %v2749_v10 = vld [vmem:[#allocation2 + $0x64] ss:$8 sps:$4 sm:$0xff]  }
 0x304   :  { %v787_v30 = vsel %vm779_vm7, %v740_v8, %v786_v9  ;;  %v754_v7 = vmax.f32 %v752_v25, %v753_v4  ;;  %v834_v35 = vrot.slane %v3320_v27, 4  ;;  %v2936_v39 = vmov 0.0   ;;  %v2751_v14 = vld [vmem:[#allocation2 + $0x60] ss:$8 sps:$4 sm:$0xff]   ;;  %v2752_v16 = vld [vmem:[#allocation2 + $0x74] ss:$8 sps:$4 sm:$0xff]  }
 0x305   :  { %v3333_v12 = vsel %vm68_vm0, 0.0, %v787_v30  ;;  %2564 = vmatprep.subr.bf16.mxu0 %v2936_v39  ;;  %v823_v46 = vsel %vm135_vm3, %v821_v31, %v822_v18  ;;  %v803_v47 = vsel %vm89_vm2, %v801_v32, %v802_v33  ;;  %1648 = vmatpush1.bf16.msra.mxu1 %v2736_v61  ;;  %v2754_v5 = vld [vmem:[#allocation2 + $0x70] ss:$8 sps:$4 sm:$0xff]   ;;  %v2755_v17 = vld [vmem:[#allocation2 + $0x84] ss:$8 sps:$4 sm:$0xff]   ;;  %v813_v20 = vrot.slane %v3316_v23, 2 }
 0x306   :  { %v788_v36 = vsel %vm781_vm8, %v754_v7, %v747_v11  ;;  %v824_v37 = vrot.slane %v3333_v12, 3  ;;  %v804_v38 = vrot.slane %v3333_v12, 1  ;;  %v836_v40 = vrot.slane %v3333_v12, 4  ;;  %1649 = vmatprep.subr.bf16.mxu1 %v2737_v62  ;;  %v2757_v19 = vld [vmem:[#allocation2 + $0x80] ss:$8 sps:$4 sm:$0xff]   ;;  %v2730_v32 = vld [vmem:[%s3609_s5 + $0x98] sm:$0xff]  }
 0x307   :  { %v3345_v41 = vsel %vm68_vm0, %v788_v36, 0.0  ;;  %v3355_v52 = vsel %vm158_vm4, %v833_v34, %v834_v35  ;;  %v814_v15 = vrot.slane %v3320_v27, 2  ;;  %v816_v21 = vrot.slane %v3333_v12, 2  ;;  %v2727_v7 = vld [vmem:[%s3609_s5 + $0x80] sm:$0xff]   ;;  %v2758_v33 = vld [vmem:[#allocation2 + $0x94] ss:$8 sps:$4 sm:$0xff]  }
 0x308   :  { %v825_v42 = vrot.slane %v3345_v41, 3  ;;  %v805_v43 = vrot.slane %v3345_v41, 1  ;;  %v837_v45 = vrot.slane %v3345_v41, 4  ;;  %v817_v22 = vrot.slane %v3345_v41, 2  ;;  %v2760_v34 = vld [vmem:[#allocation2 + $0x90] ss:$8 sps:$4 sm:$0xff]  }
 0x309   :  { %1650 = vmatpush1.bf16.msra.mxu1 %v2739_v63  ;;  %v815_v9 = vsel %vm112_vm1, %v813_v20, %v814_v15  ;;  %v2761_v35 = vld [vmem:[#allocation2 + $0xa4] ss:$8 sps:$4 sm:$0xff]   ;;  %v2763_v36 = vld [vmem:[#allocation2 + $0xa0] ss:$8 sps:$4 sm:$0xff]  }
 0x30a   :  { %v826_v48 = vsel %vm135_vm3, %v824_v37, %v825_v42  ;;  %v806_v51 = vsel %vm89_vm2, %v804_v38, %v805_v43  ;;  %v3358_v54 = vsel %vm158_vm4, %v836_v40, %v837_v45  ;;  %1651 = vmatprep.subr.bf16.mxu1 %v2740_v0  ;;  %v818_v29 = vsel %vm112_vm1, %v816_v21, %v817_v22  ;;  %v2764_v37 = vld [vmem:[#allocation2 + $0xb4] ss:$8 sps:$4 sm:$0xff]   ;;  %v2766_v38 = vld [vmem:[#allocation2 + $0xb0] ss:$8 sps:$4 sm:$0xff]   ;;  %v2767_v40 = vld [vmem:[#allocation2 + $0xc4] ss:$8 sps:$4 sm:$0xff]  }
 0x30b   :  { %v2689_v55 = vpack.i.bf16 %v826_v48, %v823_v46  ;;  %v2694_v56 = vpack.i.bf16 %v806_v51, %v803_v47  ;;  %v847_v57 = vpack.c.bf16 %v3358_v54, %v3355_v52  ;;  %v2769_v41 = vld [vmem:[#allocation2 + $0xc0] ss:$8 sps:$4 sm:$0xff]   ;;  %v2770_v42 = vld [vmem:[#allocation2 + $0xd4] ss:$8 sps:$4 sm:$0xff]   ;;  %v2772_v43 = vld [vmem:[#allocation2 + $0xd0] ss:$8 sps:$4 sm:$0xff]  }
 0x30c   :  { %v2773_v45 = vld [vmem:[#allocation2 + $0xe4] ss:$8 sps:$4 sm:$0xff]   ;;  %v2775_v46 = vld [vmem:[#allocation2 + $0xe0] ss:$8 sps:$4 sm:$0xff]   ;;  %v2776_v47 = vld [vmem:[#allocation2 + $0xf4] ss:$8 sps:$4 sm:$0xff]  }
 0x30d   :  { %2690 = vrot.lane.b32.xlu0 %v2689_v55, %s2932_s3  ;;  %2695 = vrot.lane.b32.xlu1 %v2694_v56, %s2932_s3  ;;  %v2778_v48 = vld [vmem:[#allocation2 + $0xf0] ss:$8 sps:$4 sm:$0xff]   ;;  %v2781_v51 = vld [vmem:[#allocation2 + $0x104] ss:$8 sps:$4 sm:$0xff]   ;;  %v2364_v59 = vld [vmem:[%s3610_s6] ss:$0 sm:$0xff] }
 0x30e   :  { %1652 = vmatpush1.bf16.msra.mxu1 %v2742_v1 }
 0x30f   :  { %1653 = vmatprep.subr.bf16.mxu1 %v2743_v2 }
 0x312   :  { %1654 = vmatpush1.bf16.msra.mxu1 %v2745_v3 }
 0x313   :  { %1655 = vmatprep.subr.bf16.mxu1 %v2746_v6 }
 0x316   :  { %1656 = vmatpush1.bf16.msra.mxu1 %v2748_v13 }
 0x317   :  { %1657 = vmatprep.subr.bf16.mxu1 %v2749_v10 }
 0x31a   :  { %1658 = vmatpush1.bf16.msra.mxu1 %v2751_v14 }
 0x31b   :  { %1659 = vmatprep.subr.bf16.mxu1 %v2752_v16 }
 0x31e   :  { %1660 = vmatpush1.bf16.msra.mxu1 %v2754_v5 }
 0x31f   :  { %1661 = vmatprep.subr.bf16.mxu1 %v2755_v17 }
 0x322   :  { %1662 = vmatpush1.bf16.msra.mxu1 %v2757_v19 }
 0x323   :  { %1663 = vmatprep.subr.bf16.mxu1 %v2758_v33 }
 0x326   :  { %1664 = vmatpush1.bf16.msra.mxu1 %v2760_v34 }
 0x327   :  { %1665 = vmatprep.subr.bf16.mxu1 %v2761_v35  ;;  %v2779_v35 = vld [vmem:[#allocation2 + $0x100] ss:$8 sps:$4 sm:$0xff]  }
 0x32a   :  { %1666 = vmatpush1.bf16.msra.mxu1 %v2763_v36 }
 0x32b   :  { %1667 = vmatprep.subr.bf16.mxu1 %v2764_v37 }
 0x32e   :  { %1668 = vmatpush1.bf16.msra.mxu1 %v2766_v38 }
 0x32f   :  { %1669 = vmatprep.subr.bf16.mxu1 %v2767_v40 }
 0x332   :  { %1670 = vmatpush1.bf16.msra.mxu1 %v2769_v41  ;;  %v2784_v41 = vld [vmem:[#allocation2 + $0x114] ss:$8 sps:$4 sm:$0xff]  }
 0x333   :  { %1671 = vmatprep.subr.bf16.mxu1 %v2770_v42 }
 0x336   :  { %1672 = vmatpush1.bf16.msra.mxu1 %v2772_v43 }
 0x337   :  { %1673 = vmatprep.subr.bf16.mxu1 %v2773_v45  ;;  %v2782_v45 = vld [vmem:[#allocation2 + $0x110] ss:$8 sps:$4 sm:$0xff]  }
 0x33a   :  { %1674 = vmatpush1.bf16.msra.mxu1 %v2775_v46  ;;  %v2787_v46 = vld [vmem:[#allocation2 + $0x124] ss:$8 sps:$4 sm:$0xff]  }
 0x33b   :  { %1675 = vmatprep.subr.bf16.mxu1 %v2776_v47  ;;  %v2785_v47 = vld [vmem:[#allocation2 + $0x120] ss:$8 sps:$4 sm:$0xff]  }
 0x33e   :  { %1676 = vmatpush1.bf16.msra.mxu1 %v2778_v48  ;;  %v2790_v48 = vld [vmem:[#allocation2 + $0x134] ss:$8 sps:$4 sm:$0xff]  }
 0x33f   :  { %1688 = vmatprep.subr.bf16.mxu1 %v2781_v51  ;;  %v2788_v51 = vld [vmem:[#allocation2 + $0x130] ss:$8 sps:$4 sm:$0xff]  }
 0x37f   :  { %v2691_v50 = vpop.permute.xlu0 %2690  ;;  %v2696_v24 = vpop.permute.xlu1 %2695 }
 0x380   :  { %v2693_v25 = vunpack.i.h.bf16 %v2691_v50  ;;  %v2692_v26 = vunpack.i.l.bf16 %v2691_v50  ;;  %v2698_v28 = vunpack.i.h.bf16 %v2696_v24  ;;  %v2697_v8 = vunpack.i.l.bf16 %v2696_v24 }
 0x382   :  { %v842_v4 = vsel %vm394_vm11, %v3333_v12, %v2698_v28  ;;  %v841_v27 = vsel %vm394_vm11, %v3316_v23, %v2697_v8  ;;  %v843_v30 = vsel %vm394_vm11, %v815_v9, %v2692_v26  ;;  %v844_v31 = vsel %vm394_vm11, %v818_v29, %v2693_v25  ;;  %v2728_v12 = vld [vmem:[%s3609_s5 + $0x88] sm:$0xff]   ;;  %v2729_v23 = vld [vmem:[%s3609_s5 + $0x90] sm:$0xff]  }
 0x383   :  { %v845_v18 = vpack.c.bf16 %v842_v4, %v841_v27  ;;  %v846_v11 = vpack.c.bf16 %v844_v31, %v843_v30  ;;  %v2847_v27 = vld [vmem:[#allocation2 + $0x264] ss:$8 sps:$4 sm:$0xff]  }
 0x385   :  { %1050 = vmatprep.mubr.bf16.mxu0 %v846_v11 }
 0x386   :  { %1051 = vmatmul.mubr.bf16.vlgmr.msra.gmra.mrb[12].mxu0 %v845_v18 }
 0x387   :  { %2565 = vmatpush3.bf16.msra.mxu0 %v2727_v7  ;;  %2572 = vmatprep.mubr.msk.bf16.mxu0 %vm2937_vm9, %v2936_v39 }
 0x388   :  { %2566 = vmatprep.subr.bf16.mxu0 %v2936_v39 }
 0x38b   :  { %2567 = vmatpush3.bf16.msra.mxu0 %v2728_v12 }
 0x38c   :  { %2568 = vmatprep.subr.bf16.mxu0 %v2936_v39 }
 0x38f   :  { %2569 = vmatpush3.bf16.msra.mxu0 %v2729_v23 }
 0x390   :  { %2570 = vmatprep.subr.bf16.mxu0 %v2936_v39 }
 0x393   :  { %2571 = vmatpush3.bf16.msra.mxu0 %v2730_v32 }
 0x396   :  { %2573 = vmatmul.mubr.msk.bf16.vlgmr.msra.gmra.mrb[16].mxu0 %vm394_vm11, %v847_v57  ;;  %vm2468_vm11 = vmpackc.low %vm3405_vm10, %vm3405_vm10 }
 0x459   :  { %v2516_v52 = vpop.f32.mrb[12].mxu0 }
 0x45a   :  { %v2517_v54 = vpop.f32.mrb[13].mxu0 }
 0x45b   :  { %v2518_v55 = vadd.f32 %v2517_v54, %v2516_v52  ;;  %v2519_v56 = vpop.f32.mrb[14].mxu0  ;;  %v2793_v52 = vld [vmem:[#allocation2 + $0x144] ss:$8 sps:$4 sm:$0xff]   ;;  %v2791_v54 = vld [vmem:[#allocation2 + $0x140] ss:$8 sps:$4 sm:$0xff]  }
 0x45c   :  { %v2520_v57 = vpop.f32.mrb[15].mxu0 }
 0x45d   :  { %v2521_v58 = vadd.f32 %v2520_v57, %v2519_v56  ;;  %v1053_v60 = vadd.f32 %v2518_v55, %v2364_v59  ;;  %v2796_v55 = vld [vmem:[#allocation2 + $0x154] ss:$8 sps:$4 sm:$0xff]   ;;  %v2794_v56 = vld [vmem:[#allocation2 + $0x150] ss:$8 sps:$4 sm:$0xff]   ;;  %v2799_v57 = vld [vmem:[#allocation2 + $0x164] ss:$8 sps:$4 sm:$0xff]  }
 0x45f   :  { %v1056_v0 = vadd.f32 %v2521_v58, %v2364_v59  ;;  %v2797_v58 = vld [vmem:[#allocation2 + $0x160] ss:$8 sps:$4 sm:$0xff]   ;;  %v2802_v59 = vld [vmem:[#allocation2 + $0x174] ss:$8 sps:$4 sm:$0xff]  }
 0x469   :  { %v1093_v61 = vpop.f32.mrb[16].mxu0 }
 0x46a   :  { %v1094_v62 = vadd.f32 %v1093_v61, %v1053_v60  ;;  %v2574_v63 = vpop.f32.mrb[17].mxu0  ;;  %v2800_v60 = vld [vmem:[#allocation2 + $0x170] ss:$8 sps:$4 sm:$0xff]   ;;  %v2805_v61 = vld [vmem:[#allocation2 + $0x184] ss:$8 sps:$4 sm:$0xff]  }
 0x46b   :  { %v1096_v1 = vpop.f32.mrb[18].mxu0  ;;  %v2808_v63 = vld [vmem:[#allocation2 + $0x194] ss:$8 sps:$4 sm:$0xff]  }
 0x46c   :  { %v1100_v2 = vmax.f32 %v1094_v62, 0.0  ;;  %v1097_v3 = vadd.f32 %v1096_v1, %v1056_v0  ;;  %v2575_v6 = vpop.f32.mrb[19].mxu0  ;;  %v2803_v62 = vld [vmem:[#allocation2 + $0x180] ss:$8 sps:$4 sm:$0xff]   ;;  %v2806_v0 = vld [vmem:[#allocation2 + $0x190] ss:$8 sps:$4 sm:$0xff]  }
 0x46d   :  { %v2811_v1 = vld [vmem:[#allocation2 + $0x1a4] ss:$8 sps:$4 sm:$0xff]   ;;  %v2812_v6 = vld [vmem:[#allocation2 + $0x1b0] ss:$8 sps:$4 sm:$0xff]  }
 0x46e   :  { %v1104_v13 = vrot.slane %v1100_v2, 6  ;;  %v1101_v10 = vmax.f32 %v1097_v3, 0.0  ;;  %v2809_v2 = vld [vmem:[#allocation2 + $0x1a0] ss:$8 sps:$4 sm:$0xff]   ;;  %v2814_v3 = vld [vmem:[#allocation2 + $0x1b4] ss:$8 sps:$4 sm:$0xff]  }
 0x470   :  { %v1108_v14 = vsel %vm68_vm0, 0.0, %v1104_v13  ;;  %v1110_v16 = vsel %vm68_vm0, %v1104_v13, 0.0  ;;  %v1105_v5 = vrot.slane %v1101_v10, 6  ;;  %v2815_v10 = vld [vmem:[#allocation2 + $0x1c0] ss:$8 sps:$4 sm:$0xff]  }
 0x471   :  { %v1124_v17 = vrot.slane %v1108_v14, 2  ;;  %v1125_v19 = vrot.slane %v1110_v16, 2  ;;  %v1140_v20 = vrot.slane %v1108_v14, 4  ;;  %v1141_v15 = vrot.slane %v1110_v16, 4 }
 0x472   :  { %v1109_v21 = vsel %vm68_vm0, 0.0, %v1105_v5  ;;  %v1111_v22 = vsel %vm68_vm0, %v1105_v5, 0.0  ;;  %v2469_v50 = vpack.c.bf16 %v1105_v5, %v1104_v13  ;;  %v1116_v24 = vrot.slane %v1108_v14, 1  ;;  %v2817_v13 = vld [vmem:[#allocation2 + $0x1c4] ss:$8 sps:$4 sm:$0xff]  }
 0x473   :  { %v1127_v25 = vrot.slane %v1109_v21, 2  ;;  %v1128_v26 = vrot.slane %v1111_v22, 2  ;;  %v1143_v28 = vrot.slane %v1109_v21, 4  ;;  %v1144_v8 = vrot.slane %v1111_v22, 4  ;;  %v2823_v5 = vld [vmem:[#allocation2 + $0x1e4] ss:$8 sps:$4 sm:$0xff]  }
 0x474   :  { %v1117_v9 = vrot.slane %v1110_v16, 1  ;;  %v1119_v29 = vrot.slane %v1109_v21, 1  ;;  %v1120_v4 = vrot.slane %v1111_v22, 1  ;;  %v1132_v30 = vrot.slane %v1108_v14, 3  ;;  %v2820_v14 = vld [vmem:[#allocation2 + $0x1d4] ss:$8 sps:$4 sm:$0xff]  }
 0x475   :  { %v1133_v31 = vrot.slane %v1110_v16, 3  ;;  %v1135_v18 = vrot.slane %v1109_v21, 3  ;;  %v1136_v11 = vrot.slane %v1111_v22, 3  ;;  %v3410_v7 = vsel %vm112_vm1, %v1124_v17, %v1125_v19  ;;  %v2818_v16 = vld [vmem:[#allocation2 + $0x1d0] ss:$8 sps:$4 sm:$0xff]  }
 0x476   :  { %v1118_v12 = vsel %vm89_vm2, %v1116_v24, %v1117_v9  ;;  %v1121_v23 = vsel %vm89_vm2, %v1119_v29, %v1120_v4  ;;  %v3415_v32 = vsel %vm112_vm1, %v1127_v25, %v1128_v26  ;;  %v3418_v33 = vsel %vm158_vm4, %v1140_v20, %v1141_v15  ;;  %v2821_v17 = vld [vmem:[#allocation2 + $0x1e0] ss:$8 sps:$4 sm:$0xff]   ;;  %v2826_v19 = vld [vmem:[#allocation2 + $0x1f4] ss:$8 sps:$4 sm:$0xff]   ;;  %v2824_v20 = vld [vmem:[#allocation2 + $0x1f0] ss:$8 sps:$4 sm:$0xff]  }
 0x477   :  { %v1149_v34 = vpack.c.bf16 %v1121_v23, %v1118_v12  ;;  %v1134_v36 = vsel %vm135_vm3, %v1132_v30, %v1133_v31  ;;  %v1137_v37 = vsel %vm135_vm3, %v1135_v18, %v1136_v11  ;;  %v1150_v38 = vpack.c.bf16 %v3415_v32, %v3410_v7  ;;  %v2829_v15 = vld [vmem:[#allocation2 + $0x204] ss:$8 sps:$4 sm:$0xff]   ;;  %v2827_v21 = vld [vmem:[#allocation2 + $0x200] ss:$8 sps:$4 sm:$0xff]   ;;  %v2832_v22 = vld [vmem:[#allocation2 + $0x214] ss:$8 sps:$4 sm:$0xff]  }
 0x478   :  { %v1151_v40 = vpack.c.bf16 %v1137_v37, %v1134_v36  ;;  %v3428_v42 = vsel %vm158_vm4, %v1143_v28, %v1144_v8  ;;  %v2835_v24 = vld [vmem:[#allocation2 + $0x224] ss:$8 sps:$4 sm:$0xff]   ;;  %v2833_v25 = vld [vmem:[#allocation2 + $0x220] ss:$8 sps:$4 sm:$0xff]   ;;  %v2838_v26 = vld [vmem:[#allocation2 + $0x234] ss:$8 sps:$4 sm:$0xff]  }
 0x479   :  { %1677 = vmatprep.mubr.bf16.mxu1 %v1149_v34  ;;  %v1152_v43 = vpack.c.bf16 %v3428_v42, %v3418_v33  ;;  %v2836_v28 = vld [vmem:[#allocation2 + $0x230] ss:$8 sps:$4 sm:$0xff]   ;;  %v2841_v8 = vld [vmem:[#allocation2 + $0x244] ss:$8 sps:$4 sm:$0xff]   ;;  %v2839_v9 = vld [vmem:[#allocation2 + $0x240] ss:$8 sps:$4 sm:$0xff]  }
 0x47a   :  { %2470 = vmatmul.mubr.msk.bf16.vlgmr.msra.gmra.mrb[0].mxu1 %vm2468_vm11, %v2469_v50  ;;  %v2830_v50 = vld [vmem:[#allocation2 + $0x210] ss:$8 sps:$4 sm:$0xff]   ;;  %v2844_v29 = vld [vmem:[#allocation2 + $0x254] ss:$8 sps:$4 sm:$0xff]   ;;  %v2851_v18 = vld [vmem:[%s3613_s9 + $0x40] sm:$0xff]   ;;  %vm2318_vm1 = vcmask 17408  }
 0x47b   :  { %1689 = vmatpush1.bf16.msra.mxu1 %v2779_v35  ;;  %1720 = vmatprep.mubr.bf16.mxu1 %v1151_v40  ;;  %v2842_v4 = vld [vmem:[#allocation2 + $0x250] ss:$8 sps:$4 sm:$0xff]   ;;  %v2850_v30 = vld [vmem:[#allocation2 + $0x274] ss:$8 sps:$4 sm:$0xff]   ;;  %v2852_v11 = vld [vmem:[%s3613_s9] sm:$0xff]  }
 0x47c   :  { %1690 = vmatprep.subr.bf16.mxu1 %v2784_v41  ;;  %v2848_v31 = vld [vmem:[#allocation2 + $0x270] ss:$8 sps:$4 sm:$0xff]   ;;  %2527 = vmatprep.subr.bf16.mxu0 %v2851_v18  ;;  %v2853_v7 = vld [vmem:[%s3613_s9 + $0x48] sm:$0xff]   ;;  %v2859_v35 = vld [vmem:[%s3613_s9 + $0x60] sm:$0xff]  }
 0x47d   :  { %2528 = vmatpush3.bf16.msra.mxu0 %v2852_v11  ;;  %v2854_v12 = vld [vmem:[%s3613_s9 + $0x8] sm:$0xff]   ;;  %v2855_v23 = vld [vmem:[%s3613_s9 + $0x50] sm:$0xff]   ;;  %v2857_v33 = vld [vmem:[%s3613_s9 + $0x58] sm:$0xff]  }
 0x47e   :  { %2529 = vmatprep.subr.bf16.mxu0 %v2853_v7  ;;  %v2856_v32 = vld [vmem:[%s3613_s9 + $0x10] sm:$0xff]   ;;  %v2858_v34 = vld [vmem:[%s3613_s9 + $0x18] sm:$0xff]   ;;  %v2860_v36 = vld [vmem:[%s3613_s9 + $0x20] sm:$0xff]  }
 0x47f   :  { %1691 = vmatpush1.bf16.msra.mxu1 %v2782_v45  ;;  %v2861_v37 = vld [vmem:[%s3613_s9 + $0x68] sm:$0xff]   ;;  %v2863_v40 = vld [vmem:[%s3613_s9 + $0x70] sm:$0xff]   ;;  %v2865_v42 = vld [vmem:[%s3613_s9 + $0x78] sm:$0xff]   ;;  %v1237_v45 = vsub.s32 0, %v3269_v49 }
 0x480   :  { %1692 = vmatprep.subr.bf16.mxu1 %v2787_v46  ;;  %v2864_v41 = vld [vmem:[%s3613_s9 + $0x30] sm:$0xff]   ;;  %v1233_v46 = vld [vmem:[%s3612_s8] sm:$0x3] }
 0x481   :  { %2530 = vmatpush3.bf16.msra.mxu0 %v2854_v12 }
 0x482   :  { %2531 = vmatprep.subr.bf16.mxu0 %v2855_v23 }
 0x483   :  { %1693 = vmatpush1.bf16.msra.mxu1 %v2785_v47  ;;  %v1241_v47 = vsub.s32 1, %v3269_v49 }
 0x484   :  { %1694 = vmatprep.subr.bf16.mxu1 %v2790_v48  ;;  %v1238_v48 = vrot.slane %v1233_v46, %v1237_v45 }
 0x485   :  { %2532 = vmatpush3.bf16.msra.mxu0 %v2856_v32 }
 0x486   :  { %2533 = vmatprep.subr.bf16.mxu0 %v2857_v33 }
 0x487   :  { %1695 = vmatpush1.bf16.msra.mxu1 %v2788_v51  ;;  %v1242_v51 = vrot.slane %v1233_v46, %v1241_v47 }
 0x488   :  { %1696 = vmatprep.subr.bf16.mxu1 %v2793_v52 }
 0x489   :  { %2534 = vmatpush3.bf16.msra.mxu0 %v2858_v34 }
 0x48a   :  { %2535 = vmatprep.subr.bf16.mxu0 %v2859_v35 }
 0x48b   :  { %1697 = vmatpush1.bf16.msra.mxu1 %v2791_v54 }
 0x48c   :  { %1698 = vmatprep.subr.bf16.mxu1 %v2796_v55 }
 0x48d   :  { %2536 = vmatpush3.bf16.msra.mxu0 %v2860_v36 }
 0x48e   :  { %2537 = vmatprep.subr.bf16.mxu0 %v2861_v37 }
 0x48f   :  { %1699 = vmatpush1.bf16.msra.mxu1 %v2794_v56 }
 0x490   :  { %1700 = vmatprep.subr.bf16.mxu1 %v2799_v57 }
 0x493   :  { %1701 = vmatpush1.bf16.msra.mxu1 %v2797_v58 }
 0x494   :  { %1702 = vmatprep.subr.bf16.mxu1 %v2802_v59 }
 0x497   :  { %1703 = vmatpush1.bf16.msra.mxu1 %v2800_v60 }
 0x498   :  { %1704 = vmatprep.subr.bf16.mxu1 %v2805_v61 }
 0x49b   :  { %1705 = vmatpush1.bf16.msra.mxu1 %v2803_v62 }
 0x49c   :  { %1706 = vmatprep.subr.bf16.mxu1 %v2808_v63 }
 0x49f   :  { %1707 = vmatpush1.bf16.msra.mxu1 %v2806_v0 }
 0x4a0   :  { %1708 = vmatprep.subr.bf16.mxu1 %v2811_v1 }
 0x4a3   :  { %1709 = vmatpush1.bf16.msra.mxu1 %v2809_v2 }
 0x4a4   :  { %1710 = vmatprep.subr.bf16.mxu1 %v2814_v3 }
 0x4a7   :  { %1711 = vmatpush1.bf16.msra.mxu1 %v2812_v6 }
 0x4a8   :  { %1712 = vmatprep.subr.bf16.mxu1 %v2817_v13 }
 0x4ab   :  { %1713 = vmatpush1.bf16.msra.mxu1 %v2815_v10 }
 0x4ac   :  { %1714 = vmatprep.subr.bf16.mxu1 %v2820_v14 }
 0x4af   :  { %1715 = vmatpush1.bf16.msra.mxu1 %v2818_v16 }
 0x4b0   :  { %1716 = vmatprep.subr.bf16.mxu1 %v2823_v5 }
 0x4b3   :  { %1717 = vmatpush1.bf16.msra.mxu1 %v2821_v17 }
 0x4b4   :  { %1718 = vmatprep.subr.bf16.mxu1 %v2826_v19 }
 0x4b7   :  { %1719 = vmatpush1.bf16.msra.mxu1 %v2824_v20 }
 0x4b8   :  { %1731 = vmatprep.subr.bf16.mxu1 %v2829_v15 }
 0x4ba   :  { %1721 = vmatmul.mubr.bf16.vlgmr.msra.gmra.mrb[0].mxu1 %v1150_v38  ;;  %v2862_v38 = vld [vmem:[%s3613_s9 + $0x28] sm:$0xff]  }
 0x4bb   :  { %1732 = vmatpush1.bf16.msra.mxu1 %v2827_v21  ;;  %1763 = vmatprep.mubr.bf16.mxu1 %v2931_v44  ;;  %v2845_v44 = vld [vmem:[#allocation2 + $0x260] ss:$8 sps:$4 sm:$0xff]  }
 0x4bc   :  { %1733 = vmatprep.subr.bf16.mxu1 %v2832_v22  ;;  %2538 = vmatpush3.bf16.msra.mxu0 %v2862_v38 }
 0x4bd   :  { %2539 = vmatprep.subr.bf16.mxu0 %v2863_v40 }
 0x4bf   :  { %1734 = vmatpush1.bf16.msra.mxu1 %v2830_v50 }
 0x4c0   :  { %1735 = vmatprep.subr.bf16.mxu1 %v2835_v24  ;;  %2540 = vmatpush3.bf16.msra.mxu0 %v2864_v41 }
 0x4c1   :  { %2541 = vmatprep.subr.bf16.mxu0 %v2865_v42 }
 0x4c3   :  { %1736 = vmatpush1.bf16.msra.mxu1 %v2833_v25 }
 0x4c4   :  { %1737 = vmatprep.subr.bf16.mxu1 %v2838_v26 }
 0x4c7   :  { %1738 = vmatpush1.bf16.msra.mxu1 %v2836_v28 }
 0x4c8   :  { %1739 = vmatprep.subr.bf16.mxu1 %v2841_v8 }
 0x4cb   :  { %1740 = vmatpush1.bf16.msra.mxu1 %v2839_v9 }
 0x4cc   :  { %1741 = vmatprep.subr.bf16.mxu1 %v2844_v29 }
 0x4cf   :  { %1742 = vmatpush1.bf16.msra.mxu1 %v2842_v4 }
 0x4d0   :  { %1743 = vmatprep.subr.bf16.mxu1 %v2847_v27 }
 0x4d3   :  { %1744 = vmatpush1.bf16.msra.mxu1 %v2845_v44 }
 0x4d4   :  { %1745 = vmatprep.subr.bf16.mxu1 %v2850_v30 }
 0x4d7   :  { %1746 = vmatpush1.bf16.msra.mxu1 %v2848_v31 }
 0x4da   :  { %1764 = vmatmul.mubr.bf16.vlgmr.msra.gmra.mrb[0].mxu1 %v1152_v43  ;;  %v2866_v43 = vld [vmem:[%s3613_s9 + $0x38] sm:$0xff]  }
 0x4db   :  { %2542 = vmatpush3.bf16.msra.mxu0 %v2866_v43 }
 0x4dc   :  { %2576 = vmatprep.subr.bf16.mxu0 %v2936_v39 }
 0x5ad   :  { %v1765_v52 = vpop.f32.mrb[0].mxu1 }
 0x5ae   :  { %v2592_v54 = vadd.f32 %v1765_v52, %v1238_v48  ;;  %v1767_v55 = vpop.f32.mrb[1].mxu1 }
 0x5af   :  { %v2593_v56 = vadd.f32 %v1767_v55, %v1242_v51  ;;  %v1769_v57 = vpop.f32.mrb[2].mxu1 }
 0x5b0   :  { %v1774_v58 = vmax.f32 %v2592_v54, 0.0  ;;  %v2594_v59 = vadd.f32 %v1769_v57, %v1238_v48  ;;  %v1771_v60 = vpop.f32.mrb[3].mxu1 }
 0x5b1   :  { %v1775_v61 = vmax.f32 %v2593_v56, 0.0  ;;  %v2595_v62 = vadd.f32 %v1771_v60, %v1242_v51 }
 0x5b2   :  { %v1776_v63 = vmax.f32 %v2594_v59, 0.0 }
 0x5b3   :  { %v1782_v0 = vcombine.low %v1774_v58, %v1775_v61  ;;  %v1783_v1 = vcombine.high %v1774_v58, %v1775_v61  ;;  %v1777_v2 = vmax.f32 %v2595_v62, 0.0 }
 0x5b5   :  { %v1790_v3 = vrot.slane %v1782_v0, %v3278_v53  ;;  %v1797_v49 = vrot.slane %v1783_v1, %v3278_v53  ;;  %v1800_v6 = vcombine.low %v1776_v63, %v1777_v2  ;;  %v1801_v13 = vcombine.high %v1776_v63, %v1777_v2 }
 0x5b7   :  { %v1798_v10 = vcombine.high %v1790_v3, %v1790_v3  ;;  %v1799_v14 = vcombine.high %v1797_v49, %v1797_v49  ;;  %v1824_v16 = vrot.slane %v1790_v3, %v3278_v53  ;;  %v1840_v5 = vrot.slane %v1797_v49, %v3278_v53 }
 0x5b8   :  { %v1808_v17 = vrot.slane %v1800_v6, %v3278_v53  ;;  %v1815_v19 = vrot.slane %v1801_v13, %v3278_v53 }
 0x5b9   :  { %v1825_v20 = vcombine.high %v1824_v16, %v1824_v16  ;;  %v1832_v15 = vrot.slane %v1798_v10, %v3278_v53  ;;  %v1841_v21 = vcombine.high %v1840_v5, %v1840_v5  ;;  %v1848_v22 = vrot.slane %v1799_v14, %v3278_v53 }
 0x5ba   :  { %v1898_v50 = vsel %vm68_vm0, %v1824_v16, -inf  ;;  %v1926_v24 = vsel %vm68_vm0, %v1840_v5, -inf  ;;  %v1816_v25 = vcombine.high %v1808_v17, %v1808_v17  ;;  %v1817_v26 = vcombine.high %v1815_v19, %v1815_v19 }
 0x5bb   :  { %v1833_v28 = vcombine.high %v1832_v15, %v1832_v15  ;;  %v1849_v8 = vcombine.high %v1848_v22, %v1848_v22  ;;  %v1899_v9 = vrot.slane %v1898_v50, 4  ;;  %v1905_v29 = vsel %vm68_vm0, %v1825_v20, -inf }
 0x5bc   :  { %v1906_v4 = vrot.slane %v1905_v29, 4  ;;  %v1912_v27 = vsel %vm68_vm0, %v1832_v15, -inf  ;;  %v1927_v44 = vrot.slane %v1926_v24, 4  ;;  %v1933_v30 = vsel %vm68_vm0, %v1841_v21, -inf }
 0x5bd   :  { %v1900_v31 = vmax.f32 %v1898_v50, %v1899_v9  ;;  %v1913_v18 = vrot.slane %v1912_v27, 4  ;;  %v1919_v11 = vsel %vm68_vm0, %v1833_v28, -inf  ;;  %v1934_v7 = vrot.slane %v1933_v30, 4 }
 0x5be   :  { %v1907_v12 = vmax.f32 %v1905_v29, %v1906_v4  ;;  %v1920_v23 = vrot.slane %v1919_v11, 4  ;;  %v1928_v32 = vmax.f32 %v1926_v24, %v1927_v44  ;;  %v1940_v33 = vsel %vm68_vm0, %v1848_v22, -inf }
 0x5bf   :  { %v1901_v34 = vrot.slane %v1900_v31, 2  ;;  %v1914_v35 = vmax.f32 %v1912_v27, %v1913_v18  ;;  %v1935_v36 = vmax.f32 %v1933_v30, %v1934_v7  ;;  %v1941_v37 = vrot.slane %v1940_v33, 4 }
 0x5c0   :  { %v1908_v38 = vrot.slane %v1907_v12, 2  ;;  %v1921_v40 = vmax.f32 %v1919_v11, %v1920_v23  ;;  %v1929_v41 = vrot.slane %v1928_v32, 2  ;;  %v1947_v42 = vsel %vm68_vm0, %v1849_v8, -inf }
 0x5c1   :  { %v1902_v43 = vmax.f32 %v1900_v31, %v1901_v34  ;;  %v1915_v45 = vrot.slane %v1914_v35, 2  ;;  %v1936_v46 = vrot.slane %v1935_v36, 2  ;;  %v1942_v47 = vmax.f32 %v1940_v33, %v1941_v37 }
 0x5c2   :  { %v3509_v48 = vmax.f32 %v1907_v12, %v1908_v38  ;;  %v1922_v51 = vrot.slane %v1921_v40, 2  ;;  %v1930_v52 = vmax.f32 %v1928_v32, %v1929_v41  ;;  %v1948_v54 = vrot.slane %v1947_v42, 4 }
 0x5c3   :  { %v1903_v55 = vrot.slane %v1902_v43, 1  ;;  %v1916_v56 = vmax.f32 %v1914_v35, %v1915_v45  ;;  %v3511_v57 = vmax.f32 %v1935_v36, %v1936_v46  ;;  %v1943_v58 = vrot.slane %v1942_v47, 2 }
 0x5c4   :  { %v1910_v59 = vrot.slane %v3509_v48, 1  ;;  %v3514_v60 = vmax.f32 %v1921_v40, %v1922_v51  ;;  %v1931_v61 = vrot.slane %v1930_v52, 1  ;;  %v3516_v62 = vmax.f32 %v1947_v42, %v1948_v54 }
 0x5c5   :  { %v3518_v63 = vmax.f32 %v1902_v43, %v1903_v55  ;;  %v1917_v0 = vrot.slane %v1916_v56, 1  ;;  %v3520_v1 = vmax.f32 %v1942_v47, %v1943_v58  ;;  %v1856_v2 = vrot.slane %v1808_v17, %v3278_v53 }
 0x5c6   :  { %v3523_v3 = vmax.f32 %v1930_v52, %v1931_v61  ;;  %v1864_v49 = vrot.slane %v1816_v25, %v3278_v53  ;;  %v1872_v6 = vrot.slane %v1815_v19, %v3278_v53  ;;  %v1880_v13 = vrot.slane %v1817_v26, %v3278_v53 }
 0x5c7   :  { %v3528_v10 = vmax.f32 %v1916_v56, %v1917_v0  ;;  %v1945_v14 = vrot.slane %v3520_v1, 1  ;;  %v1857_v16 = vcombine.high %v1856_v2, %v1856_v2  ;;  %v1954_v5 = vsel %vm68_vm0, %v1856_v2, -inf }
 0x5c8   :  { %v1865_v20 = vcombine.high %v1864_v49, %v1864_v49  ;;  %v1873_v15 = vcombine.high %v1872_v6, %v1872_v6  ;;  %v1881_v21 = vcombine.high %v1880_v13, %v1880_v13  ;;  %v1955_v22 = vrot.slane %v1954_v5, 4 }
 0x5c9   :  { %v2010_v17 = vmax.f32 %v3518_v63, %v3528_v10  ;;  %v1961_v50 = vsel %vm68_vm0, %v1857_v16, -inf  ;;  %v1968_v19 = vsel %vm68_vm0, %v1864_v49, -inf  ;;  %v1982_v53 = vsel %vm68_vm0, %v1872_v6, -inf }
 0x5ca   :  { %v1956_v24 = vmax.f32 %v1954_v5, %v1955_v22  ;;  %v1962_v25 = vrot.slane %v1961_v50, 4  ;;  %v1969_v26 = vrot.slane %v1968_v19, 4  ;;  %v1975_v28 = vsel %vm68_vm0, %v1865_v20, -inf }
 0x5cb   :  { %v1976_v8 = vrot.slane %v1975_v28, 4  ;;  %v1983_v9 = vrot.slane %v1982_v53, 4  ;;  %v1989_v29 = vsel %vm68_vm0, %v1873_v15, -inf  ;;  %v1996_v4 = vsel %vm68_vm0, %v1880_v13, -inf }
 0x5cc   :  { %v1957_v27 = vrot.slane %v1956_v24, 2  ;;  %v1963_v44 = vmax.f32 %v1961_v50, %v1962_v25  ;;  %v1970_v30 = vmax.f32 %v1968_v19, %v1969_v26  ;;  %v1990_v31 = vrot.slane %v1989_v29, 4 }
 0x5cd   :  { %v1977_v18 = vmax.f32 %v1975_v28, %v1976_v8  ;;  %v1984_v11 = vmax.f32 %v1982_v53, %v1983_v9  ;;  %v1997_v7 = vrot.slane %v1996_v4, 4  ;;  %v2003_v12 = vsel %vm68_vm0, %v1881_v21, -inf }
 0x5ce   :  { %v1958_v23 = vmax.f32 %v1956_v24, %v1957_v27  ;;  %v1964_v32 = vrot.slane %v1963_v44, 2  ;;  %v1971_v33 = vrot.slane %v1970_v30, 2  ;;  %v1991_v34 = vmax.f32 %v1989_v29, %v1990_v31 }
 0x5cf   :  { %v1978_v35 = vrot.slane %v1977_v18, 2  ;;  %v1985_v36 = vrot.slane %v1984_v11, 2  ;;  %v1998_v37 = vmax.f32 %v1996_v4, %v1997_v7  ;;  %v2004_v38 = vrot.slane %v2003_v12, 4 }
 0x5d0   :  { %v1959_v40 = vrot.slane %v1958_v23, 1  ;;  %v1965_v41 = vmax.f32 %v1963_v44, %v1964_v32  ;;  %v1972_v42 = vmax.f32 %v1970_v30, %v1971_v33  ;;  %v1992_v43 = vrot.slane %v1991_v34, 2 }
 0x5d1   :  { %v1979_v45 = vmax.f32 %v1977_v18, %v1978_v35  ;;  %v1986_v46 = vmax.f32 %v1984_v11, %v1985_v36  ;;  %v1999_v47 = vrot.slane %v1998_v37, 2  ;;  %v2005_v51 = vmax.f32 %v2003_v12, %v2004_v38  ;;  %v2867_v35 = vld [vmem:[%s3615_s11] sm:$0xff]   ;;  %v2869_v38 = vld [vmem:[%s3615_s11 + $0x10] sm:$0xff]  }
 0x5d2   :  { %v1960_v52 = vmax.f32 %v1958_v23, %v1959_v40  ;;  %v1966_v54 = vrot.slane %v1965_v41, 1  ;;  %v1973_v55 = vrot.slane %v1972_v42, 1  ;;  %v1993_v56 = vmax.f32 %v1991_v34, %v1992_v43  ;;  %v2870_v40 = vld [vmem:[%s3615_s11 + $0x18] sm:$0xff]  }
 0x5d3   :  { %v1987_v58 = vrot.slane %v1986_v46, 1  ;;  %v2000_v61 = vmax.f32 %v1998_v37, %v1999_v47  ;;  %v1911_v0 = vmax.f32 %v3509_v48, %v1910_v59  ;;  %v1924_v2 = vrot.slane %v3514_v60, 1  ;;  %v2868_v37 = vld [vmem:[%s3615_s11 + $0x8] sm:$0xff]  }
 0x5d4   :  { %v1974_v49 = vmax.f32 %v1972_v42, %v1973_v55  ;;  %v1938_v6 = vrot.slane %v3511_v57, 1  ;;  %v1950_v13 = vrot.slane %v3516_v62, 2  ;;  %v1967_v16 = vmax.f32 %v1965_v41, %v1966_v54  ;;  %v2871_v41 = vld [vmem:[%s3615_s11 + $0x20] sm:$0xff]   ;;  %v2872_v42 = vld [vmem:[%s3615_s11 + $0x28] sm:$0x1f]  }
 0x5d5   :  { %v1988_v5 = vmax.f32 %v1986_v46, %v1987_v58  ;;  %v2001_v20 = vrot.slane %v2000_v61, 1  ;;  %v1925_v15 = vmax.f32 %v3514_v60, %v1924_v2  ;;  %v1980_v21 = vrot.slane %v1979_v45, 1  ;;  %v2471_v46 = vld [vmem:[%s3614_s10] ss:$0 sm:$0xff]  ;;  %s2938_s10 = smov [#allocation5]  }
 0x5d6   :  { %v2016_v22 = vmax.f32 %v1960_v52, %v1974_v49  ;;  %v1939_v50 = vmax.f32 %v3511_v57, %v1938_v6  ;;  %v1951_v19 = vmax.f32 %v3516_v62, %v1950_v13  ;;  %v1994_v53 = vrot.slane %v1993_v56, 1  ;;  %v2488_v58 = vld [vmem:[%s3616_s12] ss:$0 sm:$0xff]  ;;  %s2337_s11 = sshll.u32 %s2938_s10, 4  ;;  %s2338_s11 = int_to_ptr.vmem [resolvable:$true] %s2337_s11 }
 0x5d7   :  { %v1981_v48 = vmax.f32 %v1979_v45, %v1980_v21  ;;  %v2006_v59 = vrot.slane %v2005_v51, 2  ;;  %v2013_v24 = vmax.f32 %v1911_v0, %v1925_v15  ;;  %v1946_v25 = vmax.f32 %v3520_v1, %v1945_v14  ;;  %s2899_s12 = scalar_lea.vmem %s2338_s11, 32  ;;  %p2904_p9 = scmp.lt.s32.totalorder %s2338_s11, %s2338_s11 }
 0x5d8   :  { %v1952_v26 = vrot.slane %v1951_v19, 1  ;;  %v1995_v28 = vmax.f32 %v1993_v56, %v1994_v53  ;;  %v2002_v8 = vmax.f32 %v2000_v61, %v2001_v20  ;;  %v2011_v60 = vmax.f32 %v2010_v17, %v3523_v3  ;;  %p2900_p8 = scmp.ne.s32.totalorder %s2338_s11, %s2899_s12  ;;  %p2905_p10 = scmp.lt.s32.totalorder %s2899_s12, %s2899_s12 }
 0x5d9   :  { %v2007_v9 = vmax.f32 %v2005_v51, %v2006_v59  ;;  %v2014_v57 = vmax.f32 %v2013_v24, %v1939_v50  ;;  %v2019_v29 = vmax.f32 %v1967_v16, %v1981_v48  ;;  %v2017_v62 = vmax.f32 %v2016_v22, %v1988_v5 }
 0x5da   :  { %v1953_v4 = vmax.f32 %v1951_v19, %v1952_v26  ;;  %v2012_v27 = vmax.f32 %v2011_v60, %v1946_v25  ;;  %v2276_v43 = vsel %vm135_vm3, %v2872_v42, 0  ;;  %vm2271_vm0 = vcmask 736256   ;;  %p2906_p11 = por %p2905_p10, %p2904_p9 }
 0x5db   :  { %v2008_v44 = vrot.slane %v2007_v9, 1  ;;  %v2020_v30 = vmax.f32 %v2019_v29, %v1995_v28  ;;  %v2018_v31 = vmax.f32 %v2017_v62, %v2002_v8 }
 0x5dc   :  { %v2015_v18 = vmax.f32 %v2014_v57, %v1953_v4  ;;  %v2022_v11 = vpack.c.bf16 %v2012_v27, %v2012_v27  ;;  %p2907_p12 = pnand %p2906_p11, %p2900_p8 }
 0x5dd   :  { %v2009_v1 = vmax.f32 %v2007_v9, %v2008_v44  ;;  %v2024_v14 = vpack.c.bf16 %v2018_v31, %v2018_v31 }
 0x5de   :  { %v2023_v12 = vpack.c.bf16 %v2015_v18, %v2015_v18  ;;  %v2069_v23 = vunpack.c.l.b16 %v2022_v11 }
 0x5df   :  { %v2021_v7 = vmax.f32 %v2020_v30, %v2009_v1  ;;  %v2071_v32 = vunpack.c.l.b16 %v2024_v14 }
 0x5e0   :  { %v2070_v3 = vunpack.c.l.b16 %v2023_v12 }
 0x5e1   :  { %v2025_v33 = vpack.c.bf16 %v2021_v7, %v2021_v7  ;;  %v2073_v63 = vsel %vm781_vm8, %v2071_v32, %v2069_v23 }
 0x5e2   :  { %v2075_v36 = vpack.c.b16 %v2073_v63, %v2073_v63 }
 0x5e3   :  { %v2072_v10 = vunpack.c.l.b16 %v2025_v33 }
 0x5e5   :  { %v2074_v17 = vsel %vm781_vm8, %v2072_v10, %v2070_v3 }
 0x5e6   :  { %v2076_v34 = vpack.c.b16 %v2074_v17, %v2074_v17 }
 0x5e8   :  { %2207 = vmatprep.mubr.bf16.mxu0 %v2076_v34 }
 0x5e9   :  { %2208 = vmatmul.mubr.bf16.vlgmr.msra.gmra.mrb[20].mxu0 %v2075_v36 }
 0x5ea   :  { %2577 = vmatpush3.bf16.msra.mxu0 %v2867_v35  ;;  %2588 = vmatprep.mubr.msk.bf16.mxu0 %vm2937_vm9, %v2936_v39 }
 0x5eb   :  { %2578 = vmatprep.subr.bf16.mxu0 %v2936_v39 }
 0x5ee   :  { %2579 = vmatpush3.bf16.msra.mxu0 %v2868_v37 }
 0x5ef   :  { %2580 = vmatprep.subr.bf16.mxu0 %v2936_v39 }
 0x5f2   :  { %2581 = vmatpush3.bf16.msra.mxu0 %v2869_v38 }
 0x5f3   :  { %2582 = vmatprep.subr.bf16.mxu0 %v2936_v39 }
 0x5f6   :  { %2583 = vmatpush3.bf16.msra.mxu0 %v2870_v40 }
 0x5f7   :  { %2584 = vmatprep.subr.bf16.mxu0 %v2936_v39 }
 0x5fa   :  { %2585 = vmatpush3.bf16.msra.mxu0 %v2871_v41 }
 0x5fb   :  { %2586 = vmatprep.subr.bf16.mxu0 %v2936_v39 }
 0x5fe   :  { %2587 = vmatpush3.bf16.msra.mxu0 %v2276_v43 }
 0x6bc   :  { %v2543_v45 = vpop.f32.mrb[20].mxu0 }
 0x6bd   :  { %v2544_v47 = vpop.f32.mrb[21].mxu0 }
 0x6be   :  { %v2545_v51 = vadd.f32 %v2544_v47, %v2543_v45  ;;  %v2546_v52 = vpop.f32.mrb[22].mxu0 }
 0x6bf   :  { %v2547_v54 = vpop.f32.mrb[23].mxu0 }
 0x6c0   :  { %v2210_v55 = vadd.f32 %v2545_v51, %v2471_v46 }
 0x6c2   :  { %v2215_v56 = vmax.f32 %v2210_v55, 0.0 }
 0x6c4   :  { %v2216_v39 = vpack.c.bf16 %v2215_v56, %v2215_v56 }
 0x6c6   :  { %2589 = vmatmul.mubr.msk.bf16.vlgmr.msra.gmra.mrb[24].mxu0 %vm2271_vm0, %v2216_v39 }
 0x799   :  { %v2312_v61 = vpop.f32.mrb[24].mxu0 }
 0x79a   :  { %v2313_v0 = vadd.f32 %v2488_v58, %v2312_v61  ;;  %v2590_v2 = vpop.f32.mrb[25].mxu0 }
 0x79b   :  { %v2315_v49 = vpop.f32.mrb[26].mxu0 }
 0x79c   :  { %v2591_v6 = vpop.f32.mrb[27].mxu0  ;;  %v2319_v13 = vsel %vm2318_vm1, %v2313_v0, -inf }
 0x79d   :  { %2320 = vmax.xlane.f32.xlu0 %v2319_v13 }
 0x82a   :  { %v2321_v16 = vpop.xlane.xlu0 %2320 }
 0x82b   :  { %v2322_v5 = vsub.f32 %v2313_v0, %v2321_v16 }
 0x82d   :  { %v2323_v20 = vmul.f32 1.442695, %v2322_v5 }
 0x82f   :  { %2873 = vpow2.f32 %v2323_v20 }
 0x839   :  { %v2874_v15 = vpop.eup %2873 }
 0x83a   :  { %v2325_v21 = vsel %vm2318_vm1, %v2874_v15, 0.0 }
 0x83b   :  { %2326 = vadd.xlane.f32.xlu1 %v2325_v21 }
 0x8c8   :  { %v2327_v22 = vpop.xlane.xlu1 %2326 }
 0x8c9   :  { %2875 = vrcp.f32 %v2327_v22 }
 0x8d3   :  { %v2876_v50 = vpop.eup %2875 }
 0x8d4   :  { %v2329_v19 = vmul.f32 %v2876_v50, %v2874_v15 }
 0x8d6   :  { %2330 = vst.msk [vmem:[#allocation5] sm:$0x3] %vm2318_vm1, %v2329_v19 }
 0x8d7   :  { %2910 = shalt.err (!%p2907_p12)
}
 0x8d8   :  { %s2911_s6 = scalar_lea.hbm %s3617_s13, 32 }
 0x8d9   :  { %p2912_p13 = scmp.ne.s32.totalorder %s3617_s13, %s2911_s6  ;;  %p2915_p0 = scmp.lt.u32.totalorder %s2911_s6, %s3617_s13 }
 0x8db   :  { %p2917_p1 = pnand %p2915_p0, %p2912_p13 }
 0x8dd   :  { %2920 = shalt.err (!%p2917_p1)
}
 0x8de   :  { %2340 = dma.vmem_to_hbm [thread:$0]  %s2338_s11, 32, %s3617_s13, [#allocation4]  }
 0x8df   :  { %2923 = dma.done.wait [#allocation4], 32  }
 0x8e0   :  { %2924 = vsyncadd [#allocation4], 4294967264 }
 0x8e1   :  { %2344 = vsyncpa [#allocation3], 1 }
 0x8e2   :  { %2345 = vsyncpa [#allocation4], 1 }

</bundles_post_ra>
